<compile_context>
chip_gen: v7x
topology: tpu7x:2x2x1
jax: 0.10.0
libtpu: 0.0.40
codegen_flags: <defaults>
</compile_context>

<pallas_src>
import functools

import numpy as np
import jax
import jax.numpy as jnp
from jax.experimental import pallas as pl
from jax.experimental.pallas import tpu as pltpu

NCLS_PAD = 32  # pad final 1x1-conv output channels -> W*32 = 512 lanes (dense stores)


# --------------------------- host-side matrix builders ----------------------
def _fold_bn(w, b, bn, eps=1e-5):
    """Fold eval-mode BN into the conv weight; return (folded_w, shift)."""
    w = np.asarray(w, np.float32)
    b = np.asarray(b, np.float32)
    if bn is None:
        return w, b
    gamma, beta, mean, var = (np.asarray(t, np.float32) for t in bn)
    scale = gamma / np.sqrt(var + eps)
    shift = beta - mean * scale + b * scale
    return w * scale[:, None, None, None], shift


def _conv3x3_mstack(wf, H, W, stride):
    """3x3 conv (pad=1) on layout A[h, w*Cin+ci]:
         out = [A(h-1) | A(h) | A(h+1)] @ Mstack   (rows picked per stride)."""
    Cout, Cin = wf.shape[0], wf.shape[1]
    Wo = W // stride
    M = np.zeros((3, W * Cin, Wo * Cout), np.float32)
    for ky in range(3):
        for wo in range(Wo):
            for kx in range(3):
                w = stride * wo + kx - 1
                if 0 <= w < W:
                    M[ky, w * Cin:(w + 1) * Cin,
                      wo * Cout:(wo + 1) * Cout] = wf[:, :, ky, kx].T
    return M.reshape(3 * W * Cin, Wo * Cout)


def _even_row_sel(spb, H):
    """Per-sample even-row selector for stride-2 convs on spb stacked samples."""
    Ho = H // 2
    S = np.zeros((spb * Ho, spb * H), np.float32)
    for s in range(spb):
        for ho in range(Ho):
            S[s * Ho + ho, s * H + 2 * ho] = 1.0
    return S


def _deconv_consts(wd, b, Hi, Wi, spb):
    """ConvTranspose2d(k=2,s=2):  P = A @ Nstack ;  up = V0@P[:, :half] + V1@P[:, half:]."""
    wd = np.asarray(wd, np.float32)
    Cin, Cout = wd.shape[0], wd.shape[1]
    Ho, Wo = 2 * Hi, 2 * Wi
    half = Wo * Cout
    N = np.zeros((Wi * Cin, 2 * half), np.float32)
    for dy in range(2):
        for wi in range(Wi):
            for dx in range(2):
                wo = 2 * wi + dx
                N[wi * Cin:(wi + 1) * Cin,
                  dy * half + wo * Cout: dy * half + (wo + 1) * Cout] = wd[:, :, dy, dx]
    V = np.zeros((2, spb * Ho, spb * Hi), np.float32)
    for dy in range(2):
        for s in range(spb):
            for hi in range(Hi):
                V[dy, s * Ho + 2 * hi + dy, s * Hi + hi] = 1.0
    brow = np.tile(np.asarray(b, np.float32), Wo)
    return N, V, brow


def _conv1x1_mat(w2, W):
    """1x1 conv as a block-diagonal (W*Cin, W*Cout) right-multiply matrix."""
    w2 = np.asarray(w2, np.float32)
    return np.kron(np.eye(W, dtype=np.float32), w2.T)


def build_constants(params, H, W, in_ch, in_ch_pad, nclasses, ncls_pad, spb):
    """Build all structured matrices, then pack them into a few slabs."""
    mats, rows = [], []

    def add_mat(name, arr):
        mats.append((name, np.asarray(arr, np.float32)))

    def add_row(name, arr):
        rows.append((name, np.asarray(arr, np.float32).reshape(1, -1)))

    h, w = H, W
    enc_strides = []
    for i, (cw, cb, bn, stride) in enumerate(params['encoders']):
        wf, sh = _fold_bn(cw, cb, bn)
        if i == 0 and in_ch_pad != in_ch:        # zero-padded input channels
            wp = np.zeros((wf.shape[0], in_ch_pad, 3, 3), np.float32)
            wp[:, :in_ch] = wf
            wf = wp
        add_mat(f"enc{i}M", _conv3x3_mstack(wf, h, w, stride))
        add_row(f"enc{i}b", np.tile(sh, w // stride))
        if stride == 2:
            add_mat(f"enc{i}sel", _even_row_sel(spb, h))
        enc_strides.append(stride)
        h //= stride
        w //= stride

    # decoders in application order (reverse of construction order)
    for j, dec in enumerate(params['decoders'][::-1]):
        cout = dec['up_w'].shape[1]
        N, V, upb = _deconv_consts(dec['up_w'], dec['up_b'], h, w, spb)
        add_mat(f"dec{j}N", N)
        add_mat(f"dec{j}V0", V[0])
        add_mat(f"dec{j}V1", V[1])
        add_row(f"dec{j}upb", upb)
        h, w = 2 * h, 2 * w
        # torch.cat((up, skip), dim=1): first `cout` channels = up, rest = skip.
        # Fuse conv1 (bottleneck 1x1) and the downsample 1x1 into ONE matrix.
        w1, s1 = _fold_bn(dec['w1'], dec['b1'], dec['bn1'])
        wdn, sd = _fold_bn(dec['wd'], dec['bd'], dec['bnd'])
        w1 = w1.reshape(w1.shape[0], w1.shape[1])
        wdn = wdn.reshape(wdn.shape[0], wdn.shape[1])
        c1cd = np.block([[_conv1x1_mat(w1[:, :cout], w), _conv1x1_mat(wdn[:, :cout], w)],
                         [_conv1x1_mat(w1[:, cout:], w), _conv1x1_mat(wdn[:, cout:], w)]])
        add_mat(f"dec{j}c1cd", c1cd)
        add_row(f"dec{j}c1cdb", np.concatenate([np.tile(s1, w), np.tile(sd, w)]))
        w2, s2 = _fold_bn(dec['w2'], dec['b2'], dec['bn2'])
        add_mat(f"dec{j}c2M", _conv3x3_mstack(w2, h, w, 1))
        add_row(f"dec{j}c2b", np.tile(s2, w))
        w3, s3 = _fold_bn(dec['w3'], dec['b3'], dec['bn3'])
        add_mat(f"dec{j}c3", _conv1x1_mat(w3.reshape(w3.shape[0], w3.shape[1]), w))
        add_row(f"dec{j}c3b", np.tile(s3, w))

    wf_, bf_ = params['final']
    wf_ = np.asarray(wf_, np.float32).reshape(nclasses, -1)
    wpad = np.zeros((ncls_pad, wf_.shape[1]), np.float32)
    wpad[:nclasses] = wf_
    bpad = np.zeros((ncls_pad,), np.float32)
    bpad[:nclasses] = np.asarray(bf_, np.float32)
    add_mat("fin", _conv1x1_mat(wpad, w))
    add_row("finb", np.tile(bpad, w))

    # ---- pack matrices into width-grouped bf16 slabs (few DMAs, dense lanes) ----
    groups = {}
    for name, arr in mats:
        wlanes = ((arr.shape[1] + 127) // 128) * 128
        groups.setdefault(wlanes, []).append((name, arr))
    consts, wlay = [], {}
    for si, wlanes in enumerate(sorted(groups)):
        chunks, r0 = [], 0
        for name, arr in groups[wlanes]:
            r, cc = arr.shape
            rp = ((r + 15) // 16) * 16          # keep bf16 sublane-tile alignment
            buf = np.zeros((rp, wlanes), np.float32)
            buf[:r, :cc] = arr
            wlay[name] = (si, r0, r, cc)
            chunks.append(buf)
            r0 += rp
        consts.append(jnp.asarray(np.concatenate(chunks, axis=0), jnp.bfloat16))

    # ---- lane-concatenate every bias / BN-shift row into one f32 row ----
    bi = len(consts)
    blay, brows, c0 = {}, [], 0
    for name, arr in rows:
        blay[name] = (bi, c0, arr.shape[1])
        brows.append(arr)
        c0 += arr.shape[1]
    consts.append(jnp.asarray(np.concatenate(brows, axis=1), jnp.float32))

    return consts, wlay, blay, enc_strides


# ------------------------------- fused kernel -------------------------------
def make_kernel(wlay, blay, enc_strides, n_dec, spb, n_consts):
    n_enc = len(enc_strides)
    bf16 = jnp.bfloat16

    def kernel(*refs):
        x_ref = refs[0]
        c = refs[1:1 + n_consts]
        o_ref = refs[1 + n_consts]

        def wmat(name):
            idx, r0, nr, nc = wlay[name]
            return c[idx][r0:r0 + nr, :nc]

        def brow(name):
            idx, c0, nc = blay[name]
            return c[idx][:, c0:c0 + nc]

        def fdot(a, b):
            return jnp.dot(a, b, preferred_element_type=jnp.float32)

        def shifted_pair(a):
            """(rows shifted down by 1, rows shifted up by 1); per-sample edge rows -> 0."""
            R = a.shape[0]
            Hc = R // spb
            row = jax.lax.broadcasted_iota(jnp.int32, a.shape, 0)
            dn = pltpu.roll(a, 1, axis=0)         # dn[r] = a[r-1]
            up = pltpu.roll(a, R - 1, axis=0)     # up[r] = a[r+1]
            mdn = row == 0
            mup = row == Hc - 1
            for s in range(1, spb):
                mdn = jnp.logical_or(mdn, row == s * Hc)
                mup = jnp.logical_or(mup, row == s * Hc + Hc - 1)
            return jnp.where(mdn, 0.0, dn), jnp.where(mup, 0.0, up)

        def conv3(a, base, stride):
            """3x3 conv (pad=1) + folded BN shift; single fat MXU dot."""
            dn, up = shifted_pair(a)
            lhs = jnp.concatenate([dn, a, up], axis=-1).astype(bf16)
            if stride == 2:
                lhs = fdot(wmat(base + "sel"), lhs).astype(bf16)
            return fdot(lhs, wmat(base + "M")) + brow(base + "b")

        def deconv(a, j):
            """ConvTranspose2d(k=2, s=2) + bias."""
            p = fdot(a.astype(bf16), wmat(f"dec{j}N"))
            half = p.shape[-1] // 2
            return (fdot(wmat(f"dec{j}V0"), p[:, :half].astype(bf16)) +
                    fdot(wmat(f"dec{j}V1"), p[:, half:].astype(bf16)) +
                    brow(f"dec{j}upb"))

        a = x_ref[0]                              # (spb*H, W*Cin_pad) f32
        skips = []
        for i in range(n_enc):                    # encoders: conv3x3 + BN + ReLU
            a = jnp.maximum(conv3(a, f"enc{i}", enc_strides[i]), 0.0)
            skips.append(a)

        last = skips[-1]
        for j in range(n_dec):                    # UpBlock: deconv -> Bottleneck
            up = deconv(last, j)
            skip = skips[-j - 2]
            cat = jnp.concatenate([up, skip], axis=-1).astype(bf16)
            z = fdot(cat, wmat(f"dec{j}c1cd")) + brow(f"dec{j}c1cdb")
            half = z.shape[-1] // 2
            h1 = jnp.maximum(z[:, :half], 0.0)    # conv1 + BN + ReLU
            res = z[:, half:]                     # downsample + BN (residual path)
            h2 = jnp.maximum(conv3(h1, f"dec{j}c2", 1), 0.0)
            main = fdot(h2.astype(bf16), wmat(f"dec{j}c3")) + brow(f"dec{j}c3b")
            last = jnp.maximum(main + res, 0.0)

        o_ref[0] = (fdot(last.astype(bf16), wmat("fin")) + brow("finb")).astype(bf16)

    return kernel


def unet_forward(x_nchw, consts, *, wlay, blay, enc_strides, n_dec, H, W,
                 in_ch, in_ch_pad, nclasses, ncls_pad, spb):
    B = x_nchw.shape[0]
    nb = B // spb
    # NCHW -> per-block layout (nb, spb*H, W*Cin_pad); tiny (few KB) XLA transpose.
    xl = jnp.transpose(x_nchw, (0, 2, 3, 1))
    if in_ch_pad != in_ch:
        xl = jnp.pad(xl, ((0, 0), (0, 0), (0, 0), (0, in_ch_pad - in_ch)))
    xl = xl.reshape(nb, spb * H, W * in_ch_pad)

    in_specs = [pl.BlockSpec((1, spb * H, W * in_ch_pad), lambda b: (b, 0, 0))]
    in_specs += [pl.BlockSpec(a.shape, lambda b: (0, 0)) for a in consts]

    out = pl.pallas_call(
        make_kernel(wlay, blay, enc_strides, n_dec, spb, len(consts)),
        out_shape=jax.ShapeDtypeStruct((nb, spb * H, W * ncls_pad), jnp.bfloat16),
        grid=(nb,),
        in_specs=in_specs,
        out_specs=pl.BlockSpec((1, spb * H, W * ncls_pad), lambda b: (b, 0, 0)),
        compiler_params=pltpu.CompilerParams(
            dimension_semantics=("parallel",),
            vmem_limit_bytes=32 * 1024 * 1024),
    )(xl, *consts)

    y = out.astype(jnp.float32).reshape(B, H, W, ncls_pad)[..., :nclasses]
    return jnp.transpose(y, (0, 3, 1, 2))          # -> NCHW


def _pick_samples_per_block(batch):
    """v7x has 2 TensorCores/chip -> keep a core-parallel grid; v5e/v6e are
    single-TC, so sublane-stack the whole batch into one grid step."""
    try:
        kind = jax.devices()[0].device_kind.lower()
    except Exception:
        kind = ""
    n_cores = 2 if "v7" in kind else 1
    if n_cores > 1 and batch % n_cores == 0:
        return batch // n_cores
    return batch


# ------------------------------ param init ----------------------------------
def _conv_w(key, cout, cin, k, std=0.1):
    return jax.random.normal(key, (cout, cin, k, k), jnp.float32) * std


def _bn(key, c):
    k1, k2 = jax.random.split(key)
    gamma = 1.0 + 0.05 * jax.random.normal(k1, (c,), jnp.float32)
    beta = 0.05 * jax.random.normal(k2, (c,), jnp.float32)
    mean = jnp.zeros((c,), jnp.float32)
    var = jnp.ones((c,), jnp.float32)
    return (gamma, beta, mean, var)


def make_params(key, in_ch, num_channels, nclasses):
    keys = iter(jax.random.split(key, 64))
    params = {}
    encoders = []
    prev = in_ch
    for sid, c in enumerate(num_channels):
        stride = 1 if sid == 0 else 2
        encoders.append((_conv_w(next(keys), c, prev, 3),
                         jnp.zeros((c,), jnp.float32), _bn(next(keys), c), stride))
        prev = c
    params['encoders'] = encoders
    decoders = []
    for up_id in range(len(num_channels) - 1):
        cin, cout = num_channels[up_id + 1], num_channels[up_id]
        dec = {
            'up_w': jax.random.normal(next(keys), (cin, cout, 2, 2), jnp.float32) * 0.1,
            'up_b': jnp.zeros((cout,), jnp.float32),
            'w1': _conv_w(next(keys), cout, 2 * cout, 1),
            'b1': jnp.zeros((cout,), jnp.float32), 'bn1': _bn(next(keys), cout),
            'w2': _conv_w(next(keys), cout, cout, 3),
            'b2': jnp.zeros((cout,), jnp.float32), 'bn2': _bn(next(keys), cout),
            'w3': _conv_w(next(keys), cout, cout, 1),
            'b3': jnp.zeros((cout,), jnp.float32), 'bn3': _bn(next(keys), cout),
            'wd': _conv_w(next(keys), cout, 2 * cout, 1),
            'bd': jnp.zeros((cout,), jnp.float32), 'bnd': _bn(next(keys), cout),
        }
        decoders.append(dec)
    params['decoders'] = decoders
    params['final'] = (_conv_w(next(keys), nclasses, num_channels[0], 1),
                       jnp.zeros((nclasses,), jnp.float32))
    return params


# ---------------------------------- main -------------------------------------
if __name__ == "__main__":
    key = jax.random.PRNGKey(0)
    k_x, k_p = jax.random.split(key)

    batch, in_ch, H, W = 2, 4, 16, 16
    num_channels = [8, 16, 32]
    nclasses = 3

    x = jax.random.normal(k_x, (batch, in_ch, H, W), jnp.float32)   # NCHW input
    params = make_params(k_p, in_ch, num_channels, nclasses)

    spb = _pick_samples_per_block(batch)          # samples stacked per grid step
    in_ch_pad = in_ch
    while (W * in_ch_pad) % 128:                  # lane-dense input tile
        in_ch_pad += 1

    consts, wlay, blay, enc_strides = build_constants(
        params, H, W, in_ch, in_ch_pad, nclasses, NCLS_PAD, spb)

    fwd = jax.jit(functools.partial(
        unet_forward, wlay=wlay, blay=blay, enc_strides=tuple(enc_strides),
        n_dec=len(num_channels) - 1, H=H, W=W, in_ch=in_ch, in_ch_pad=in_ch_pad,
        nclasses=nclasses, ncls_pad=NCLS_PAD, spb=spb))

    out = jax.block_until_ready(fwd(x, consts))

    assert out.shape == (batch, nclasses, H, W), out.shape
    assert bool(jnp.all(jnp.isfinite(out)))
    print("KERNEL_OK")
</pallas_src>

<mosaic_0001>
module attributes {stable_mosaic.version = 11 : i64} {
  func.func @kernel(%arg0: i32, %arg1: memref<1x32x128xf32, #tpu.memory_space<vmem>>, %arg2: memref<2304x128xbf16, #tpu.memory_space<vmem>>, %arg3: memref<768x256xbf16, #tpu.memory_space<vmem>>, %arg4: memref<128x512xbf16, #tpu.memory_space<vmem>>, %arg5: memref<1x2176xf32, #tpu.memory_space<vmem>>, %arg6: memref<1x32x512xbf16, #tpu.memory_space<vmem>>) attributes {dimension_semantics = [#tpu.dimension_semantics<parallel>], iteration_bounds = array<i64: 1>, scalar_prefetch = 0 : i64, scratch_operands = 0 : i64, tpu.core_type = #tpu.core_type<tc>, window_params = [{transform_indices = @transform_0, window_bounds = array<i64: 1, 32, 128>}, {pipeline_mode = #tpu.pipeline_mode<synchronous>, transform_indices = @transform_1, window_bounds = array<i64: 2304, 128>}, {pipeline_mode = #tpu.pipeline_mode<synchronous>, transform_indices = @transform_2, window_bounds = array<i64: 768, 256>}, {pipeline_mode = #tpu.pipeline_mode<synchronous>, transform_indices = @transform_3, window_bounds = array<i64: 128, 512>}, {pipeline_mode = #tpu.pipeline_mode<synchronous>, transform_indices = @transform_4, window_bounds = array<i64: 1, 2176>}, {transform_indices = @transform_5, window_bounds = array<i64: 1, 32, 512>}]} {
    %c0 = arith.constant 0 : index
    %c0_0 = arith.constant 0 : index
    %c0_1 = arith.constant 0 : index
    %0 = vector.load %arg1[%c0, %c0_0, %c0_1] : memref<1x32x128xf32, #tpu.memory_space<vmem>>, vector<1x32x128xf32>
    %1 = vector.shape_cast %0 : vector<1x32x128xf32> to vector<32x128xf32>
    %2 = tpu.iota {dimensions = array<i32: 0>} : vector<32x128xi32>
    %c1_i32 = arith.constant 1 : i32
    %3 = tpu.dynamic_rotate %1 by %c1_i32 dim 0 : vector<32x128xf32>, i32 -> vector<32x128xf32>
    %c31_i32 = arith.constant 31 : i32
    %4 = tpu.dynamic_rotate %1 by %c31_i32 dim 0 : vector<32x128xf32>, i32 -> vector<32x128xf32>
    %c0_i32 = arith.constant 0 : i32
    %5 = vector.broadcast %c0_i32 : i32 to vector<32x128xi32>
    %6 = arith.cmpi eq, %2, %5 : vector<32x128xi32>
    %c15_i32 = arith.constant 15 : i32
    %7 = vector.broadcast %c15_i32 : i32 to vector<32x128xi32>
    %8 = arith.cmpi eq, %2, %7 : vector<32x128xi32>
    %c16_i32 = arith.constant 16 : i32
    %9 = vector.broadcast %c16_i32 : i32 to vector<32x128xi32>
    %10 = arith.cmpi eq, %2, %9 : vector<32x128xi32>
    %11 = arith.ori %6, %10 : vector<32x128xi1>
    %c31_i32_2 = arith.constant 31 : i32
    %12 = vector.broadcast %c31_i32_2 : i32 to vector<32x128xi32>
    %13 = arith.cmpi eq, %2, %12 : vector<32x128xi32>
    %14 = arith.ori %8, %13 : vector<32x128xi1>
    %cst = arith.constant 0.000000e+00 : f32
    %15 = vector.broadcast %cst : f32 to vector<32x128xf32>
    %16 = arith.select %11, %15, %3 : vector<32x128xi1>, vector<32x128xf32>
    %cst_3 = arith.constant 0.000000e+00 : f32
    %17 = vector.broadcast %cst_3 : f32 to vector<32x128xf32>
    %18 = arith.select %14, %17, %4 : vector<32x128xi1>, vector<32x128xf32>
    %19 = tpu.concatenate %16, %1, %18 in 1 : vector<32x128xf32>, vector<32x128xf32>, vector<32x128xf32> -> vector<32x384xf32>
    %20 = arith.truncf %19 : vector<32x384xf32> to vector<32x384xbf16>
    %c0_4 = arith.constant 0 : index
    %c0_5 = arith.constant 0 : index
    %21 = vector.load %arg2[%c0_4, %c0_5] : memref<2304x128xbf16, #tpu.memory_space<vmem>>, vector<384x128xbf16>
    %cst_6 = arith.constant dense<0.000000e+00> : vector<32x128xf32>
    %22 = tpu.matmul %20, %21, %cst_6 {dimension_numbers = #tpu.dot_dimension_numbers<[1], [0], [0], [1], [0, 0, 1, 1], [], []>} : vector<32x384xbf16>, vector<384x128xbf16>, vector<32x128xf32> -> vector<32x128xf32>
    %c0_7 = arith.constant 0 : index
    %c0_8 = arith.constant 0 : index
    %23 = vector.load %arg5[%c0_7, %c0_8] : memref<1x2176xf32, #tpu.memory_space<vmem>>, vector<1x128xf32>
    %24 = vector.broadcast %23 : vector<1x128xf32> to vector<32x128xf32>
    %25 = arith.addf %22, %24 : vector<32x128xf32>
    %cst_9 = arith.constant 0.000000e+00 : f32
    %26 = vector.broadcast %cst_9 : f32 to vector<32x128xf32>
    %27 = arith.maximumf %25, %26 : vector<32x128xf32>
    %28 = tpu.iota {dimensions = array<i32: 0>} : vector<32x128xi32>
    %c1_i32_10 = arith.constant 1 : i32
    %29 = tpu.dynamic_rotate %27 by %c1_i32_10 dim 0 : vector<32x128xf32>, i32 -> vector<32x128xf32>
    %c31_i32_11 = arith.constant 31 : i32
    %30 = tpu.dynamic_rotate %27 by %c31_i32_11 dim 0 : vector<32x128xf32>, i32 -> vector<32x128xf32>
    %c0_i32_12 = arith.constant 0 : i32
    %31 = vector.broadcast %c0_i32_12 : i32 to vector<32x128xi32>
    %32 = arith.cmpi eq, %28, %31 : vector<32x128xi32>
    %c15_i32_13 = arith.constant 15 : i32
    %33 = vector.broadcast %c15_i32_13 : i32 to vector<32x128xi32>
    %34 = arith.cmpi eq, %28, %33 : vector<32x128xi32>
    %c16_i32_14 = arith.constant 16 : i32
    %35 = vector.broadcast %c16_i32_14 : i32 to vector<32x128xi32>
    %36 = arith.cmpi eq, %28, %35 : vector<32x128xi32>
    %37 = arith.ori %32, %36 : vector<32x128xi1>
    %c31_i32_15 = arith.constant 31 : i32
    %38 = vector.broadcast %c31_i32_15 : i32 to vector<32x128xi32>
    %39 = arith.cmpi eq, %28, %38 : vector<32x128xi32>
    %40 = arith.ori %34, %39 : vector<32x128xi1>
    %cst_16 = arith.constant 0.000000e+00 : f32
    %41 = vector.broadcast %cst_16 : f32 to vector<32x128xf32>
    %42 = arith.select %37, %41, %29 : vector<32x128xi1>, vector<32x128xf32>
    %cst_17 = arith.constant 0.000000e+00 : f32
    %43 = vector.broadcast %cst_17 : f32 to vector<32x128xf32>
    %44 = arith.select %40, %43, %30 : vector<32x128xi1>, vector<32x128xf32>
    %45 = tpu.concatenate %42, %27, %44 in 1 : vector<32x128xf32>, vector<32x128xf32>, vector<32x128xf32> -> vector<32x384xf32>
    %46 = arith.truncf %45 : vector<32x384xf32> to vector<32x384xbf16>
    %c768 = arith.constant 768 : index
    %c0_18 = arith.constant 0 : index
    %47 = vector.load %arg2[%c768, %c0_18] : memref<2304x128xbf16, #tpu.memory_space<vmem>>, vector<16x32xbf16>
    %cst_19 = arith.constant dense<0.000000e+00> : vector<16x384xf32>
    %48 = tpu.matmul %47, %46, %cst_19 {dimension_numbers = #tpu.dot_dimension_numbers<[1], [0], [0], [1], [0, 0, 1, 1], [], []>} : vector<16x32xbf16>, vector<32x384xbf16>, vector<16x384xf32> -> vector<16x384xf32>
    %49 = arith.truncf %48 : vector<16x384xf32> to vector<16x384xbf16>
    %c384 = arith.constant 384 : index
    %c0_20 = arith.constant 0 : index
    %50 = vector.load %arg2[%c384, %c0_20] : memref<2304x128xbf16, #tpu.memory_space<vmem>>, vector<384x128xbf16>
    %cst_21 = arith.constant dense<0.000000e+00> : vector<16x128xf32>
    %51 = tpu.matmul %49, %50, %cst_21 {dimension_numbers = #tpu.dot_dimension_numbers<[1], [0], [0], [1], [0, 0, 1, 1], [], []>} : vector<16x384xbf16>, vector<384x128xbf16>, vector<16x128xf32> -> vector<16x128xf32>
    %c0_22 = arith.constant 0 : index
    %c128 = arith.constant 128 : index
    %52 = vector.load %arg5[%c0_22, %c128] : memref<1x2176xf32, #tpu.memory_space<vmem>>, vector<1x128xf32>
    %53 = vector.broadcast %52 : vector<1x128xf32> to vector<16x128xf32>
    %54 = arith.addf %51, %53 : vector<16x128xf32>
    %cst_23 = arith.constant 0.000000e+00 : f32
    %55 = vector.broadcast %cst_23 : f32 to vector<16x128xf32>
    %56 = arith.maximumf %54, %55 : vector<16x128xf32>
    %57 = tpu.iota {dimensions = array<i32: 0>} : vector<16x128xi32>
    %c1_i32_24 = arith.constant 1 : i32
    %58 = tpu.dynamic_rotate %56 by %c1_i32_24 dim 0 : vector<16x128xf32>, i32 -> vector<16x128xf32>
    %c15_i32_25 = arith.constant 15 : i32
    %59 = tpu.dynamic_rotate %56 by %c15_i32_25 dim 0 : vector<16x128xf32>, i32 -> vector<16x128xf32>
    %c0_i32_26 = arith.constant 0 : i32
    %60 = vector.broadcast %c0_i32_26 : i32 to vector<16x128xi32>
    %61 = arith.cmpi eq, %57, %60 : vector<16x128xi32>
    %c7_i32 = arith.constant 7 : i32
    %62 = vector.broadcast %c7_i32 : i32 to vector<16x128xi32>
    %63 = arith.cmpi eq, %57, %62 : vector<16x128xi32>
    %c8_i32 = arith.constant 8 : i32
    %64 = vector.broadcast %c8_i32 : i32 to vector<16x128xi32>
    %65 = arith.cmpi eq, %57, %64 : vector<16x128xi32>
    %66 = arith.ori %61, %65 : vector<16x128xi1>
    %c15_i32_27 = arith.constant 15 : i32
    %67 = vector.broadcast %c15_i32_27 : i32 to vector<16x128xi32>
    %68 = arith.cmpi eq, %57, %67 : vector<16x128xi32>
    %69 = arith.ori %63, %68 : vector<16x128xi1>
    %cst_28 = arith.constant 0.000000e+00 : f32
    %70 = vector.broadcast %cst_28 : f32 to vector<16x128xf32>
    %71 = arith.select %66, %70, %58 : vector<16x128xi1>, vector<16x128xf32>
    %cst_29 = arith.constant 0.000000e+00 : f32
    %72 = vector.broadcast %cst_29 : f32 to vector<16x128xf32>
    %73 = arith.select %69, %72, %59 : vector<16x128xi1>, vector<16x128xf32>
    %74 = tpu.concatenate %71, %56, %73 in 1 : vector<16x128xf32>, vector<16x128xf32>, vector<16x128xf32> -> vector<16x384xf32>
    %75 = arith.truncf %74 : vector<16x384xf32> to vector<16x384xbf16>
    %c1168 = arith.constant 1168 : index
    %c0_30 = arith.constant 0 : index
    %76 = vector.load %arg2[%c1168, %c0_30] : memref<2304x128xbf16, #tpu.memory_space<vmem>>, vector<8x16xbf16>
    %cst_31 = arith.constant dense<0.000000e+00> : vector<8x384xf32>
    %77 = tpu.matmul %76, %75, %cst_31 {dimension_numbers = #tpu.dot_dimension_numbers<[1], [0], [0], [1], [0, 0, 1, 1], [], []>} : vector<8x16xbf16>, vector<16x384xbf16>, vector<8x384xf32> -> vector<8x384xf32>
    %78 = arith.truncf %77 : vector<8x384xf32> to vector<8x384xbf16>
    %c784 = arith.constant 784 : index
    %c0_32 = arith.constant 0 : index
    %79 = vector.load %arg2[%c784, %c0_32] : memref<2304x128xbf16, #tpu.memory_space<vmem>>, vector<384x128xbf16>
    %cst_33 = arith.constant dense<0.000000e+00> : vector<8x128xf32>
    %80 = tpu.matmul %78, %79, %cst_33 {dimension_numbers = #tpu.dot_dimension_numbers<[1], [0], [0], [1], [0, 0, 1, 1], [], []>} : vector<8x384xbf16>, vector<384x128xbf16>, vector<8x128xf32> -> vector<8x128xf32>
    %c0_34 = arith.constant 0 : index
    %c256 = arith.constant 256 : index
    %81 = vector.load %arg5[%c0_34, %c256] : memref<1x2176xf32, #tpu.memory_space<vmem>>, vector<1x128xf32>
    %82 = vector.broadcast %81 : vector<1x128xf32> to vector<8x128xf32>
    %83 = arith.addf %80, %82 : vector<8x128xf32>
    %cst_35 = arith.constant 0.000000e+00 : f32
    %84 = vector.broadcast %cst_35 : f32 to vector<8x128xf32>
    %85 = arith.maximumf %83, %84 : vector<8x128xf32>
    %86 = arith.truncf %85 : vector<8x128xf32> to vector<8x128xbf16>
    %c0_36 = arith.constant 0 : index
    %c0_37 = arith.constant 0 : index
    %87 = vector.load %arg3[%c0_36, %c0_37] : memref<768x256xbf16, #tpu.memory_space<vmem>>, vector<128x256xbf16>
    %cst_38 = arith.constant dense<0.000000e+00> : vector<8x256xf32>
    %88 = tpu.matmul %86, %87, %cst_38 {dimension_numbers = #tpu.dot_dimension_numbers<[1], [0], [0], [1], [0, 0, 1, 1], [], []>} : vector<8x128xbf16>, vector<128x256xbf16>, vector<8x256xf32> -> vector<8x256xf32>
    %c1184 = arith.constant 1184 : index
    %c0_39 = arith.constant 0 : index
    %89 = vector.load %arg2[%c1184, %c0_39] : memref<2304x128xbf16, #tpu.memory_space<vmem>>, vector<16x8xbf16>
    %90 = vector.extract_strided_slice %88 {offsets = [0, 0], sizes = [8, 128], strides = [1, 1]} : vector<8x256xf32> to vector<8x128xf32>
    %91 = arith.truncf %90 : vector<8x128xf32> to vector<8x128xbf16>
    %cst_40 = arith.constant dense<0.000000e+00> : vector<16x128xf32>
    %92 = tpu.matmul %89, %91, %cst_40 {dimension_numbers = #tpu.dot_dimension_numbers<[1], [0], [0], [1], [0, 0, 1, 1], [], []>} : vector<16x8xbf16>, vector<8x128xbf16>, vector<16x128xf32> -> vector<16x128xf32>
    %c1200 = arith.constant 1200 : index
    %c0_41 = arith.constant 0 : index
    %93 = vector.load %arg2[%c1200, %c0_41] : memref<2304x128xbf16, #tpu.memory_space<vmem>>, vector<16x8xbf16>
    %94 = vector.extract_strided_slice %88 {offsets = [0, 128], sizes = [8, 128], strides = [1, 1]} : vector<8x256xf32> to vector<8x128xf32>
    %95 = arith.truncf %94 : vector<8x128xf32> to vector<8x128xbf16>
    %cst_42 = arith.constant dense<0.000000e+00> : vector<16x128xf32>
    %96 = tpu.matmul %93, %95, %cst_42 {dimension_numbers = #tpu.dot_dimension_numbers<[1], [0], [0], [1], [0, 0, 1, 1], [], []>} : vector<16x8xbf16>, vector<8x128xbf16>, vector<16x128xf32> -> vector<16x128xf32>
    %97 = arith.addf %92, %96 : vector<16x128xf32>
    %c0_43 = arith.constant 0 : index
    %c384_44 = arith.constant 384 : index
    %98 = vector.load %arg5[%c0_43, %c384_44] : memref<1x2176xf32, #tpu.memory_space<vmem>>, vector<1x128xf32>
    %99 = vector.broadcast %98 : vector<1x128xf32> to vector<16x128xf32>
    %100 = arith.addf %97, %99 : vector<16x128xf32>
    %101 = tpu.concatenate %100, %56 in 1 : vector<16x128xf32>, vector<16x128xf32> -> vector<16x256xf32>
    %102 = arith.truncf %101 : vector<16x256xf32> to vector<16x256xbf16>
    %c128_45 = arith.constant 128 : index
    %c0_46 = arith.constant 0 : index
    %103 = vector.load %arg3[%c128_45, %c0_46] : memref<768x256xbf16, #tpu.memory_space<vmem>>, vector<256x256xbf16>
    %cst_47 = arith.constant dense<0.000000e+00> : vector<16x256xf32>
    %104 = tpu.matmul %102, %103, %cst_47 {dimension_numbers = #tpu.dot_dimension_numbers<[1], [0], [0], [1], [0, 0, 1, 1], [], []>} : vector<16x256xbf16>, vector<256x256xbf16>, vector<16x256xf32> -> vector<16x256xf32>
    %c0_48 = arith.constant 0 : index
    %c512 = arith.constant 512 : index
    %105 = vector.load %arg5[%c0_48, %c512] : memref<1x2176xf32, #tpu.memory_space<vmem>>, vector<1x256xf32>
    %106 = vector.broadcast %105 : vector<1x256xf32> to vector<16x256xf32>
    %107 = arith.addf %104, %106 : vector<16x256xf32>
    %108 = vector.extract_strided_slice %107 {offsets = [0, 0], sizes = [16, 128], strides = [1, 1]} : vector<16x256xf32> to vector<16x128xf32>
    %cst_49 = arith.constant 0.000000e+00 : f32
    %109 = vector.broadcast %cst_49 : f32 to vector<16x128xf32>
    %110 = arith.maximumf %108, %109 : vector<16x128xf32>
    %111 = vector.extract_strided_slice %107 {offsets = [0, 128], sizes = [16, 128], strides = [1, 1]} : vector<16x256xf32> to vector<16x128xf32>
    %112 = tpu.iota {dimensions = array<i32: 0>} : vector<16x128xi32>
    %c1_i32_50 = arith.constant 1 : i32
    %113 = tpu.dynamic_rotate %110 by %c1_i32_50 dim 0 : vector<16x128xf32>, i32 -> vector<16x128xf32>
    %c15_i32_51 = arith.constant 15 : i32
    %114 = tpu.dynamic_rotate %110 by %c15_i32_51 dim 0 : vector<16x128xf32>, i32 -> vector<16x128xf32>
    %c0_i32_52 = arith.constant 0 : i32
    %115 = vector.broadcast %c0_i32_52 : i32 to vector<16x128xi32>
    %116 = arith.cmpi eq, %112, %115 : vector<16x128xi32>
    %c7_i32_53 = arith.constant 7 : i32
    %117 = vector.broadcast %c7_i32_53 : i32 to vector<16x128xi32>
    %118 = arith.cmpi eq, %112, %117 : vector<16x128xi32>
    %c8_i32_54 = arith.constant 8 : i32
    %119 = vector.broadcast %c8_i32_54 : i32 to vector<16x128xi32>
    %120 = arith.cmpi eq, %112, %119 : vector<16x128xi32>
    %121 = arith.ori %116, %120 : vector<16x128xi1>
    %c15_i32_55 = arith.constant 15 : i32
    %122 = vector.broadcast %c15_i32_55 : i32 to vector<16x128xi32>
    %123 = arith.cmpi eq, %112, %122 : vector<16x128xi32>
    %124 = arith.ori %118, %123 : vector<16x128xi1>
    %cst_56 = arith.constant 0.000000e+00 : f32
    %125 = vector.broadcast %cst_56 : f32 to vector<16x128xf32>
    %126 = arith.select %121, %125, %113 : vector<16x128xi1>, vector<16x128xf32>
    %cst_57 = arith.constant 0.000000e+00 : f32
    %127 = vector.broadcast %cst_57 : f32 to vector<16x128xf32>
    %128 = arith.select %124, %127, %114 : vector<16x128xi1>, vector<16x128xf32>
    %129 = tpu.concatenate %126, %110, %128 in 1 : vector<16x128xf32>, vector<16x128xf32>, vector<16x128xf32> -> vector<16x384xf32>
    %130 = arith.truncf %129 : vector<16x384xf32> to vector<16x384xbf16>
    %c1216 = arith.constant 1216 : index
    %c0_58 = arith.constant 0 : index
    %131 = vector.load %arg2[%c1216, %c0_58] : memref<2304x128xbf16, #tpu.memory_space<vmem>>, vector<384x128xbf16>
    %cst_59 = arith.constant dense<0.000000e+00> : vector<16x128xf32>
    %132 = tpu.matmul %130, %131, %cst_59 {dimension_numbers = #tpu.dot_dimension_numbers<[1], [0], [0], [1], [0, 0, 1, 1], [], []>} : vector<16x384xbf16>, vector<384x128xbf16>, vector<16x128xf32> -> vector<16x128xf32>
    %c0_60 = arith.constant 0 : index
    %c768_61 = arith.constant 768 : index
    %133 = vector.load %arg5[%c0_60, %c768_61] : memref<1x2176xf32, #tpu.memory_space<vmem>>, vector<1x128xf32>
    %134 = vector.broadcast %133 : vector<1x128xf32> to vector<16x128xf32>
    %135 = arith.addf %132, %134 : vector<16x128xf32>
    %cst_62 = arith.constant 0.000000e+00 : f32
    %136 = vector.broadcast %cst_62 : f32 to vector<16x128xf32>
    %137 = arith.maximumf %135, %136 : vector<16x128xf32>
    %138 = arith.truncf %137 : vector<16x128xf32> to vector<16x128xbf16>
    %c1600 = arith.constant 1600 : index
    %c0_63 = arith.constant 0 : index
    %139 = vector.load %arg2[%c1600, %c0_63] : memref<2304x128xbf16, #tpu.memory_space<vmem>>, vector<128x128xbf16>
    %cst_64 = arith.constant dense<0.000000e+00> : vector<16x128xf32>
    %140 = tpu.matmul %138, %139, %cst_64 {dimension_numbers = #tpu.dot_dimension_numbers<[1], [0], [0], [1], [0, 0, 1, 1], [], []>} : vector<16x128xbf16>, vector<128x128xbf16>, vector<16x128xf32> -> vector<16x128xf32>
    %c0_65 = arith.constant 0 : index
    %c896 = arith.constant 896 : index
    %141 = vector.load %arg5[%c0_65, %c896] : memref<1x2176xf32, #tpu.memory_space<vmem>>, vector<1x128xf32>
    %142 = vector.broadcast %141 : vector<1x128xf32> to vector<16x128xf32>
    %143 = arith.addf %140, %142 : vector<16x128xf32>
    %144 = arith.addf %143, %111 : vector<16x128xf32>
    %cst_66 = arith.constant 0.000000e+00 : f32
    %145 = vector.broadcast %cst_66 : f32 to vector<16x128xf32>
    %146 = arith.maximumf %144, %145 : vector<16x128xf32>
    %147 = arith.truncf %146 : vector<16x128xf32> to vector<16x128xbf16>
    %c384_67 = arith.constant 384 : index
    %c0_68 = arith.constant 0 : index
    %148 = vector.load %arg3[%c384_67, %c0_68] : memref<768x256xbf16, #tpu.memory_space<vmem>>, vector<128x256xbf16>
    %cst_69 = arith.constant dense<0.000000e+00> : vector<16x256xf32>
    %149 = tpu.matmul %147, %148, %cst_69 {dimension_numbers = #tpu.dot_dimension_numbers<[1], [0], [0], [1], [0, 0, 1, 1], [], []>} : vector<16x128xbf16>, vector<128x256xbf16>, vector<16x256xf32> -> vector<16x256xf32>
    %c1728 = arith.constant 1728 : index
    %c0_70 = arith.constant 0 : index
    %150 = vector.load %arg2[%c1728, %c0_70] : memref<2304x128xbf16, #tpu.memory_space<vmem>>, vector<32x16xbf16>
    %151 = vector.extract_strided_slice %149 {offsets = [0, 0], sizes = [16, 128], strides = [1, 1]} : vector<16x256xf32> to vector<16x128xf32>
    %152 = arith.truncf %151 : vector<16x128xf32> to vector<16x128xbf16>
    %cst_71 = arith.constant dense<0.000000e+00> : vector<32x128xf32>
    %153 = tpu.matmul %150, %152, %cst_71 {dimension_numbers = #tpu.dot_dimension_numbers<[1], [0], [0], [1], [0, 0, 1, 1], [], []>} : vector<32x16xbf16>, vector<16x128xbf16>, vector<32x128xf32> -> vector<32x128xf32>
    %c1760 = arith.constant 1760 : index
    %c0_72 = arith.constant 0 : index
    %154 = vector.load %arg2[%c1760, %c0_72] : memref<2304x128xbf16, #tpu.memory_space<vmem>>, vector<32x16xbf16>
    %155 = vector.extract_strided_slice %149 {offsets = [0, 128], sizes = [16, 128], strides = [1, 1]} : vector<16x256xf32> to vector<16x128xf32>
    %156 = arith.truncf %155 : vector<16x128xf32> to vector<16x128xbf16>
    %cst_73 = arith.constant dense<0.000000e+00> : vector<32x128xf32>
    %157 = tpu.matmul %154, %156, %cst_73 {dimension_numbers = #tpu.dot_dimension_numbers<[1], [0], [0], [1], [0, 0, 1, 1], [], []>} : vector<32x16xbf16>, vector<16x128xbf16>, vector<32x128xf32> -> vector<32x128xf32>
    %158 = arith.addf %153, %157 : vector<32x128xf32>
    %c0_74 = arith.constant 0 : index
    %c1024 = arith.constant 1024 : index
    %159 = vector.load %arg5[%c0_74, %c1024] : memref<1x2176xf32, #tpu.memory_space<vmem>>, vector<1x128xf32>
    %160 = vector.broadcast %159 : vector<1x128xf32> to vector<32x128xf32>
    %161 = arith.addf %158, %160 : vector<32x128xf32>
    %162 = tpu.concatenate %161, %27 in 1 : vector<32x128xf32>, vector<32x128xf32> -> vector<32x256xf32>
    %163 = arith.truncf %162 : vector<32x256xf32> to vector<32x256xbf16>
    %c512_75 = arith.constant 512 : index
    %c0_76 = arith.constant 0 : index
    %164 = vector.load %arg3[%c512_75, %c0_76] : memref<768x256xbf16, #tpu.memory_space<vmem>>, vector<256x256xbf16>
    %cst_77 = arith.constant dense<0.000000e+00> : vector<32x256xf32>
    %165 = tpu.matmul %163, %164, %cst_77 {dimension_numbers = #tpu.dot_dimension_numbers<[1], [0], [0], [1], [0, 0, 1, 1], [], []>} : vector<32x256xbf16>, vector<256x256xbf16>, vector<32x256xf32> -> vector<32x256xf32>
    %c0_78 = arith.constant 0 : index
    %c1152 = arith.constant 1152 : index
    %166 = vector.load %arg5[%c0_78, %c1152] : memref<1x2176xf32, #tpu.memory_space<vmem>>, vector<1x256xf32>
    %167 = vector.broadcast %166 : vector<1x256xf32> to vector<32x256xf32>
    %168 = arith.addf %165, %167 : vector<32x256xf32>
    %169 = vector.extract_strided_slice %168 {offsets = [0, 0], sizes = [32, 128], strides = [1, 1]} : vector<32x256xf32> to vector<32x128xf32>
    %cst_79 = arith.constant 0.000000e+00 : f32
    %170 = vector.broadcast %cst_79 : f32 to vector<32x128xf32>
    %171 = arith.maximumf %169, %170 : vector<32x128xf32>
    %172 = vector.extract_strided_slice %168 {offsets = [0, 128], sizes = [32, 128], strides = [1, 1]} : vector<32x256xf32> to vector<32x128xf32>
    %173 = tpu.iota {dimensions = array<i32: 0>} : vector<32x128xi32>
    %c1_i32_80 = arith.constant 1 : i32
    %174 = tpu.dynamic_rotate %171 by %c1_i32_80 dim 0 : vector<32x128xf32>, i32 -> vector<32x128xf32>
    %c31_i32_81 = arith.constant 31 : i32
    %175 = tpu.dynamic_rotate %171 by %c31_i32_81 dim 0 : vector<32x128xf32>, i32 -> vector<32x128xf32>
    %c0_i32_82 = arith.constant 0 : i32
    %176 = vector.broadcast %c0_i32_82 : i32 to vector<32x128xi32>
    %177 = arith.cmpi eq, %173, %176 : vector<32x128xi32>
    %c15_i32_83 = arith.constant 15 : i32
    %178 = vector.broadcast %c15_i32_83 : i32 to vector<32x128xi32>
    %179 = arith.cmpi eq, %173, %178 : vector<32x128xi32>
    %c16_i32_84 = arith.constant 16 : i32
    %180 = vector.broadcast %c16_i32_84 : i32 to vector<32x128xi32>
    %181 = arith.cmpi eq, %173, %180 : vector<32x128xi32>
    %182 = arith.ori %177, %181 : vector<32x128xi1>
    %c31_i32_85 = arith.constant 31 : i32
    %183 = vector.broadcast %c31_i32_85 : i32 to vector<32x128xi32>
    %184 = arith.cmpi eq, %173, %183 : vector<32x128xi32>
    %185 = arith.ori %179, %184 : vector<32x128xi1>
    %cst_86 = arith.constant 0.000000e+00 : f32
    %186 = vector.broadcast %cst_86 : f32 to vector<32x128xf32>
    %187 = arith.select %182, %186, %174 : vector<32x128xi1>, vector<32x128xf32>
    %cst_87 = arith.constant 0.000000e+00 : f32
    %188 = vector.broadcast %cst_87 : f32 to vector<32x128xf32>
    %189 = arith.select %185, %188, %175 : vector<32x128xi1>, vector<32x128xf32>
    %190 = tpu.concatenate %187, %171, %189 in 1 : vector<32x128xf32>, vector<32x128xf32>, vector<32x128xf32> -> vector<32x384xf32>
    %191 = arith.truncf %190 : vector<32x384xf32> to vector<32x384xbf16>
    %c1792 = arith.constant 1792 : index
    %c0_88 = arith.constant 0 : index
    %192 = vector.load %arg2[%c1792, %c0_88] : memref<2304x128xbf16, #tpu.memory_space<vmem>>, vector<384x128xbf16>
    %cst_89 = arith.constant dense<0.000000e+00> : vector<32x128xf32>
    %193 = tpu.matmul %191, %192, %cst_89 {dimension_numbers = #tpu.dot_dimension_numbers<[1], [0], [0], [1], [0, 0, 1, 1], [], []>} : vector<32x384xbf16>, vector<384x128xbf16>, vector<32x128xf32> -> vector<32x128xf32>
    %c0_90 = arith.constant 0 : index
    %c1408 = arith.constant 1408 : index
    %194 = vector.load %arg5[%c0_90, %c1408] : memref<1x2176xf32, #tpu.memory_space<vmem>>, vector<1x128xf32>
    %195 = vector.broadcast %194 : vector<1x128xf32> to vector<32x128xf32>
    %196 = arith.addf %193, %195 : vector<32x128xf32>
    %cst_91 = arith.constant 0.000000e+00 : f32
    %197 = vector.broadcast %cst_91 : f32 to vector<32x128xf32>
    %198 = arith.maximumf %196, %197 : vector<32x128xf32>
    %199 = arith.truncf %198 : vector<32x128xf32> to vector<32x128xbf16>
    %c2176 = arith.constant 2176 : index
    %c0_92 = arith.constant 0 : index
    %200 = vector.load %arg2[%c2176, %c0_92] : memref<2304x128xbf16, #tpu.memory_space<vmem>>, vector<128x128xbf16>
    %cst_93 = arith.constant dense<0.000000e+00> : vector<32x128xf32>
    %201 = tpu.matmul %199, %200, %cst_93 {dimension_numbers = #tpu.dot_dimension_numbers<[1], [0], [0], [1], [0, 0, 1, 1], [], []>} : vector<32x128xbf16>, vector<128x128xbf16>, vector<32x128xf32> -> vector<32x128xf32>
    %c0_94 = arith.constant 0 : index
    %c1536 = arith.constant 1536 : index
    %202 = vector.load %arg5[%c0_94, %c1536] : memref<1x2176xf32, #tpu.memory_space<vmem>>, vector<1x128xf32>
    %203 = vector.broadcast %202 : vector<1x128xf32> to vector<32x128xf32>
    %204 = arith.addf %201, %203 : vector<32x128xf32>
    %205 = arith.addf %204, %172 : vector<32x128xf32>
    %cst_95 = arith.constant 0.000000e+00 : f32
    %206 = vector.broadcast %cst_95 : f32 to vector<32x128xf32>
    %207 = arith.maximumf %205, %206 : vector<32x128xf32>
    %208 = arith.truncf %207 : vector<32x128xf32> to vector<32x128xbf16>
    %c0_96 = arith.constant 0 : index
    %c0_97 = arith.constant 0 : index
    %209 = vector.load %arg4[%c0_96, %c0_97] : memref<128x512xbf16, #tpu.memory_space<vmem>>, vector<128x512xbf16>
    %cst_98 = arith.constant dense<0.000000e+00> : vector<32x512xf32>
    %210 = tpu.matmul %208, %209, %cst_98 {dimension_numbers = #tpu.dot_dimension_numbers<[1], [0], [0], [1], [0, 0, 1, 1], [], []>} : vector<32x128xbf16>, vector<128x512xbf16>, vector<32x512xf32> -> vector<32x512xf32>
    %c0_99 = arith.constant 0 : index
    %c1664 = arith.constant 1664 : index
    %211 = vector.load %arg5[%c0_99, %c1664] : memref<1x2176xf32, #tpu.memory_space<vmem>>, vector<1x512xf32>
    %212 = vector.broadcast %211 : vector<1x512xf32> to vector<32x512xf32>
    %213 = arith.addf %210, %212 : vector<32x512xf32>
    %214 = arith.truncf %213 : vector<32x512xf32> to vector<32x512xbf16>
    %c0_100 = arith.constant 0 : index
    %c0_101 = arith.constant 0 : index
    %c0_102 = arith.constant 0 : index
    %215 = vector.load %arg6[%c0_100, %c0_101, %c0_102] : memref<1x32x512xbf16, #tpu.memory_space<vmem>>, vector<1x32x512xbf16>
    %216 = vector.shape_cast %215 : vector<1x32x512xbf16> to vector<32x512xbf16>
    %217 = vector.shape_cast %214 : vector<32x512xbf16> to vector<1x32x512xbf16>
    tpu.vector_store %arg6[%c0_100, %c0_101, %c0_102], %217 {strides = array<i32>} : memref<1x32x512xbf16, #tpu.memory_space<vmem>>, vector<1x32x512xbf16>,
    return
  }
  func.func @transform_0(%arg0: i32) -> (i32, i32, i32) {
    %c0_i32 = arith.constant 0 : i32
    %c0_i32_0 = arith.constant 0 : i32
    %c0_i32_1 = arith.constant 0 : i32
    return %arg0, %c0_i32, %c0_i32_0 : i32, i32, i32
  }
  func.func @transform_1(%arg0: i32) -> (i32, i32) {
    %c0_i32 = arith.constant 0 : i32
    %c0_i32_0 = arith.constant 0 : i32
    %c0_i32_1 = arith.constant 0 : i32
    return %c0_i32, %c0_i32_0 : i32, i32
  }
  func.func @transform_2(%arg0: i32) -> (i32, i32) {
    %c0_i32 = arith.constant 0 : i32
    %c0_i32_0 = arith.constant 0 : i32
    %c0_i32_1 = arith.constant 0 : i32
    return %c0_i32, %c0_i32_0 : i32, i32
  }
  func.func @transform_3(%arg0: i32) -> (i32, i32) {
    %c0_i32 = arith.constant 0 : i32
    %c0_i32_0 = arith.constant 0 : i32
    %c0_i32_1 = arith.constant 0 : i32
    return %c0_i32, %c0_i32_0 : i32, i32
  }
  func.func @transform_4(%arg0: i32) -> (i32, i32) {
    %c0_i32 = arith.constant 0 : i32
    %c0_i32_0 = arith.constant 0 : i32
    %c0_i32_1 = arith.constant 0 : i32
    return %c0_i32, %c0_i32_0 : i32, i32
  }
  func.func @transform_5(%arg0: i32) -> (i32, i32, i32) {
    %c0_i32 = arith.constant 0 : i32
    %c0_i32_0 = arith.constant 0 : i32
    %c0_i32_1 = arith.constant 0 : i32
    return %arg0, %c0_i32, %c0_i32_0 : i32, i32, i32
  }
}

</mosaic_0001>

<bundles_post_ra>
// kernel: unet_forward.1
= control target key start
LH: loop header
LB: loop body
LE: loop exit
PB: predicated region body
PF: predicated region fallthrough
CT: control target
= control target key end

     0   :  { %10 = vsyncpa [#allocation3], 0  ;;  %s5532_s0 = inlined_call_operand.vmem [shape: f32[1,32,128], index: 0, kind: input, shape index: {}]   ;;  %s5533_s1 = inlined_call_operand.vmem [shape: bf16[2304,128], index: 1, kind: input, shape index: {}]   ;;  %s5534_s2 = inlined_call_operand.hbm [shape: bf16[768,256], index: 2, kind: input, shape index: {}]   ;;  %s5535_s3 = inlined_call_operand.hbm [shape: bf16[128,512], index: 3, kind: input, shape index: {}]   ;;  %s5536_s4 = inlined_call_operand.vmem [shape: f32[1,2176], index: 4, kind: input, shape index: {}]   ;;  %s5537_s5 = inlined_call_operand.vmem [shape: bf16[1,32,512], index: 5, kind: output, shape index: {}]  }
   0x1   :  { %11 = vsyncpa [#allocation5], 0  ;;  %s4699_s18 = smov [#allocation2]   ;;  %s4651_s22 = scalar_lea.hbm %s5534_s2, 12288 }
   0x2   :  { %s21_s19 = sshll.u32 %s4699_s18, 4  ;;  %p4652_p0 = scmp.ne.s32.totalorder %s5534_s2, %s4651_s22  ;;  %s22_s19 = int_to_ptr.vmem [resolvable:$true] %s21_s19 }
   0x3   :  { %p4655_p1 = scmp.lt.u32.totalorder %s4651_s22, %s5534_s2 }
   0x5   :  { %p4657_p2 = pnand %p4655_p1, %p4652_p0 }
   0x7   :  { %4660 = shalt.err (!%p4657_p2)
}
   0x8   :  { %s4661_s27 = scalar_lea.vmem %s22_s19, 12288  ;;  %p4666_p4 = scmp.lt.s32.totalorder %s22_s19, %s22_s19 }
   0x9   :  { %p4662_p3 = scmp.ne.s32.totalorder %s22_s19, %s4661_s27  ;;  %p4667_p5 = scmp.lt.s32.totalorder %s4661_s27, %s4661_s27 }
   0xb   :  { %p4668_p6 = por %p4667_p5, %p4666_p4 }
   0xd   :  { %p4669_p7 = pnand %p4668_p6, %p4662_p3 }
   0xf   :  { %4672 = shalt.err (!%p4669_p7)
}
  0x10   :  { %s4700_s28 = smov 128   ;;  %s4701_s29 = smov 8  }
  0x11   :  { %27 = dma.hbm_to_vmem [thread:$0]  %s5534_s2, 12288, %s22_s19, [#allocation3], %s4700_s28, %s4700_s28, %s4701_s29  }
  0x12   :  { %s4702_s7 = smov [#allocation4]   ;;  %s4673_s11 = scalar_lea.hbm %s5535_s3, 4096 }
  0x13   :  { %s33_s8 = sshll.u32 %s4702_s7, 4  ;;  %p4674_p8 = scmp.ne.s32.totalorder %s5535_s3, %s4673_s11  ;;  %s34_s8 = int_to_ptr.vmem [resolvable:$true] %s33_s8 }
  0x14   :  { %p4677_p9 = scmp.lt.u32.totalorder %s4673_s11, %s5535_s3 }
  0x16   :  { %p4679_p10 = pnand %p4677_p9, %p4674_p8 }
  0x18   :  { %4682 = shalt.err (!%p4679_p10)
}
  0x19   :  { %s4683_s16 = scalar_lea.vmem %s34_s8, 4096  ;;  %p4688_p12 = scmp.lt.s32.totalorder %s34_s8, %s34_s8 }
  0x1a   :  { %p4684_p11 = scmp.ne.s32.totalorder %s34_s8, %s4683_s16  ;;  %p4689_p13 = scmp.lt.s32.totalorder %s4683_s16, %s4683_s16 }
  0x1c   :  { %p4690_p0 = por %p4689_p13, %p4688_p12 }
  0x1e   :  { %p4691_p1 = pnand %p4690_p0, %p4684_p11 }
  0x20   :  { %4694 = shalt.err (!%p4691_p1)
}
  0x21   :  { %s4703_s2 = smov 256   ;;  %s4704_s17 = smov 16  }
  0x22   :  { %39 = dma.hbm_to_vmem [thread:$0]  %s5535_s3, 4096, %s34_s8, [#allocation5], %s4703_s2, %s4703_s2, %s4704_s17  }
  0x23   :  { %4695 = dma.done.wait [#allocation3], 12288  }
  0x24   :  { %4696 = vsyncadd [#allocation3], 4294955008 }
  0x25   :  { %4697 = dma.done.wait [#allocation5], 4096  }
  0x26   :  { %4698 = vsyncadd [#allocation5], 4294963200  ;;  %v4316_v0 = vld [vmem:[%s5533_s1 + $0x40] sm:$0xff]   ;;  %v4318_v2 = vld [vmem:[%s5533_s1 + $0x48] sm:$0xff]   ;;  %v53_v13 = vlaneseq  ;;  %vm4705_vm4 = vmmov 1   ;;  %v4706_v59 = vmov 0  }
  0x27   :  { %v4317_v1 = vld [vmem:[%s5533_s1] sm:$0xff]   ;;  %3921 = vmatprep.subr.bf16.mxu0 %v4316_v0  ;;  %v4320_v4 = vld [vmem:[%s5533_s1 + $0x8] sm:$0xff]   ;;  %v4321_v5 = vld [vmem:[%s5533_s1 + $0x50] sm:$0xff]   ;;  %vm452_vm11 = vcmask 261120   ;;  %vm4708_vm12 = vmmov 0  }
  0x28   :  { %3922 = vmatpush3.bf16.msra.mxu0 %v4317_v1  ;;  %v4319_v3 = vld [vmem:[%s5533_s1 + $0x80] sm:$0xff]   ;;  %v4322_v6 = vld [vmem:[%s5533_s1 + $0x88] sm:$0xff]   ;;  %v4323_v7 = vld [vmem:[%s5533_s1 + $0x10] sm:$0xff]   ;;  %v4811_v17 = vshrl.u32 %v53_v13, 7 }
  0x29   :  { %3923 = vmatprep.subr.bf16.mxu0 %v4318_v2  ;;  %4124 = vmatprep.subr.bf16.mxu1 %v4319_v3  ;;  %v4324_v8 = vld [vmem:[%s5533_s1 + $0x58] sm:$0xff]   ;;  %v4325_v9 = vld [vmem:[%s5533_s1 + $0x90] sm:$0xff]   ;;  %v4327_v11 = vld [vmem:[%s5533_s1 + $0x60] sm:$0xff]  }
  0x2a   :  { %4125 = vmatpush3.bf16.msra.mxu1 %v4319_v3  ;;  %v4326_v10 = vld [vmem:[%s5533_s1 + $0x18] sm:$0xff]   ;;  %v4329_v14 = vld [vmem:[%s5533_s1 + $0x20] sm:$0xff]   ;;  %v4330_v16 = vld [vmem:[%s5533_s1 + $0x68] sm:$0xff]   ;;  %v4820_v20 = vadd.s32 8, %v4811_v17  ;;  %vm3915_vm0 = vcmp.ne.s32.totalorder %v4811_v17, 0  ;;  %v57_v23 = vadd.s32 24, %v4811_v17 }
  0x2b   :  { %4126 = vmatprep.subr.bf16.mxu1 %v4322_v6  ;;  %v4328_v12 = vld [vmem:[%s5533_s1 + $0x98] sm:$0xff]   ;;  %v4331_v15 = vld [vmem:[%s5533_s1 + $0xa0] sm:$0xff]   ;;  %v4332_v18 = vld [vmem:[%s5533_s1 + $0x28] sm:$0xff]   ;;  %vm62_vm1 = vcmp.lt.s32.totalorder %v4811_v17, 1  ;;  %vm71_vm2 = vcmp.lt.s32.totalorder %v4811_v17, 7  ;;  %v56_v29 = vadd.s32 16, %v4811_v17 }
  0x2c   :  { %3924 = vmatpush3.bf16.msra.mxu0 %v4320_v4  ;;  %v4334_v19 = vld [vmem:[%s5533_s1 + $0xa8] sm:$0xff]   ;;  %v4333_v21 = vld [vmem:[%s5533_s1 + $0x70] sm:$0xff]   ;;  %v4336_v24 = vld [vmem:[%s5533_s1 + $0x78] sm:$0xff]   ;;  %vm3917_vm3 = vcmp.ne.s32.totalorder %v4820_v20, 15  ;;  %vm3918_vm6 = vcmp.ne.s32.totalorder %v57_v23, 31  ;;  %vm3920_vm13 = vcmp.ne.s32.totalorder %v4811_v17, 7 }
  0x2d   :  { %3925 = vmatprep.subr.bf16.mxu0 %v4321_v5  ;;  %v4335_v22 = vld [vmem:[%s5533_s1 + $0x30] sm:$0xff]   ;;  %v49_v26 = vld [vmem:[%s5532_s0] sm:$0xff]  ;;  %v50_v27 = vld [vmem:[%s5532_s0 + $0x8] sm:$0xff]  ;;  %vm3916_vm9 = vcmp.ne.s32.totalorder %v56_v29, 16  ;;  %vm3919_vm14 = vcmp.ne.s32.totalorder %v4820_v20, 8 }
  0x2e   :  { %4127 = vmatpush3.bf16.msra.mxu1 %v4322_v6  ;;  %v4337_v25 = vld [vmem:[%s5533_s1 + $0xb0] sm:$0xff]   ;;  %v52_v28 = vld [vmem:[%s5532_s0 + $0x18] sm:$0xff]  ;;  %v58_v30 = vrot.slane %v49_v26, 7  ;;  %v59_v31 = vrot.slane %v50_v27, 7  ;;  %v67_v32 = vrot.slane %v49_v26, 1  ;;  %v68_v33 = vrot.slane %v50_v27, 1  ;;  %vm4852_vm5 = vmpackc.low %vm4705_vm4, %vm3915_vm0 }
  0x2f   :  { %4128 = vmatprep.subr.bf16.mxu1 %v4325_v9  ;;  %v4338_v35 = vld [vmem:[%s5533_s1 + $0x38] sm:$0xff]   ;;  %v109_v36 = vpack.c.bf16 %v50_v27, %v49_v26  ;;  %v61_v37 = vrot.slane %v52_v28, 7  ;;  %v51_v38 = vld [vmem:[%s5532_s0 + $0x10] sm:$0xff]  ;;  %vm4867_vm7 = vmpackc.low %vm3917_vm3, %vm4705_vm4  ;;  %v70_v42 = vrot.slane %v52_v28, 1 }
  0x30   :  { %3926 = vmatpush3.bf16.msra.mxu0 %v4323_v7  ;;  %v69_v39 = vrot.slane %v51_v38, 1  ;;  %v74_v40 = vsel %vm71_vm2, %v67_v32, %v68_v33  ;;  %v65_v43 = vsel %vm62_vm1, %v58_v30, %v59_v31  ;;  %v4339_v45 = vld [vmem:[%s5533_s1 + $0xb8] sm:$0xff]   ;;  %v60_v46 = vrot.slane %v51_v38, 7  ;;  %vm4882_vm8 = vmpackc.low %vm3918_vm6, %vm4705_vm4  ;;  %v4341_v60 = vld [vmem:[%s5533_s1 + $0x100] sm:$0xff]  }
  0x31   :  { %3927 = vmatprep.subr.bf16.mxu0 %v4324_v8  ;;  %v66_v44 = vsel %vm62_vm1, %v61_v37, %v58_v30  ;;  %345 = vmatprep.mubr.bf16.mxu0 %v109_v36  ;;  %v75_v52 = vsel %vm71_vm2, %v70_v42, %v67_v32  ;;  %v112_v53 = vpack.c.bf16 %v52_v28, %v51_v38  ;;  %vm4891_vm10 = vmpackc.low %vm4705_vm4, %vm3916_vm9  ;;  %v4342_v61 = vld [vmem:[%s5533_s1 + $0xc0] sm:$0xff]   ;;  %v4343_v62 = vld [vmem:[%s5533_s1 + $0x108] sm:$0xff]   ;;  %vm1371_vm4 = vcmask 1043456  }
  0x32   :  { %4129 = vmatpush3.bf16.msra.mxu1 %v4325_v9  ;;  %v73_v47 = vsel %vm71_vm2, %v68_v33, %v69_v39  ;;  %v3568_v50 = vpack.c.bf16 %v65_v43, %v66_v44  ;;  %v72_v51 = vsel %vm71_vm2, %v69_v39, %v70_v42  ;;  %v63_v56 = vsel %vm62_vm1, %v60_v46, %v61_v37  ;;  %v4344_v63 = vld [vmem:[%s5533_s1 + $0xc8] sm:$0xff]   ;;  %v4346_v0 = vld [vmem:[%s5533_s1 + $0x110] sm:$0xff]   ;;  %v4349_v2 = vld [vmem:[%s5533_s1 + $0x118] sm:$0xff]  }
  0x33   :  { %4130 = vmatprep.subr.bf16.mxu1 %v4328_v12  ;;  %v3576_v49 = vpack.c.bf16 %v73_v47, %v74_v40  ;;  %v3580_v55 = vpack.c.bf16 %v75_v52, %v72_v51  ;;  %v64_v57 = vsel %vm62_vm1, %v59_v31, %v60_v46  ;;  %v4347_v1 = vld [vmem:[%s5533_s1 + $0xd0] sm:$0xff]   ;;  %v4350_v3 = vld [vmem:[%s5533_s1 + $0xd8] sm:$0xff]   ;;  %v4352_v4 = vld [vmem:[%s5533_s1 + $0x120] sm:$0xff]   ;;  %vm1367_vm6 = vcmask 64512  }
  0x34   :  { %3928 = vmatpush3.bf16.msra.mxu0 %v4326_v10  ;;  %v3572_v58 = vpack.c.bf16 %v63_v56, %v64_v57  ;;  %v4353_v5 = vld [vmem:[%s5533_s1 + $0xe0] sm:$0xff]   ;;  %v4355_v6 = vld [vmem:[%s5533_s1 + $0x128] sm:$0xff]   ;;  %v4358_v8 = vld [vmem:[%s5533_s1 + $0x130] sm:$0xff]  }
  0x35   :  { %3929 = vmatprep.subr.bf16.mxu0 %v4327_v11  ;;  %4140 = vmatprep.mubr.msk.bf16.mxu1 %vm4867_vm7, %v3576_v49  ;;  %v4356_v7 = vld [vmem:[%s5533_s1 + $0xe8] sm:$0xff]   ;;  %v3541_v11 = vld [vmem:[%s5536_s4] ss:$0 sm:$0xff]  ;;  %vm5043_vm15 = vmpackc.low %vm3917_vm3, %vm3920_vm13 }
  0x36   :  { %4131 = vmatpush3.bf16.msra.mxu1 %v4328_v12  ;;  %vm5058_vm3 = vmpackc.low %vm3919_vm14, %vm3915_vm0  ;;  %vm850_vm0 = vcmask 130048   ;;  %v4482_v20 = vld [vmem:[%s5533_s1 + $0x2f8] sm:$0xff]   ;;  %v4591_v34 = vld [vmem:[%s5533_s1 + $0x420] sm:$0xff]  }
  0x37   :  { %4132 = vmatprep.subr.bf16.mxu1 %v4331_v15  ;;  %v4593_v54 = vld [vmem:[%s5533_s1 + $0x430] sm:$0xff]   ;;  %v4594_v41 = vld [vmem:[%s5533_s1 + $0x438] sm:$0xff]  }
  0x38   :  { %3930 = vmatpush3.bf16.msra.mxu0 %v4329_v14  ;;  %v4598_v48 = vld [vmem:[%s5533_s1 + $0x458] sm:$0xff]  }
  0x39   :  { %3931 = vmatprep.subr.bf16.mxu0 %v4330_v16 }
  0x3a   :  { %4133 = vmatpush3.bf16.msra.mxu1 %v4331_v15 }
  0x3b   :  { %4134 = vmatprep.subr.bf16.mxu1 %v4334_v19 }
  0x3c   :  { %3932 = vmatpush3.bf16.msra.mxu0 %v4332_v18 }
  0x3d   :  { %3933 = vmatprep.subr.bf16.mxu0 %v4333_v21 }
  0x3e   :  { %4135 = vmatpush3.bf16.msra.mxu1 %v4334_v19 }
  0x3f   :  { %4136 = vmatprep.subr.bf16.mxu1 %v4337_v25 }
  0x40   :  { %3934 = vmatpush3.bf16.msra.mxu0 %v4335_v22 }
  0x41   :  { %3935 = vmatprep.subr.bf16.mxu0 %v4336_v24 }
  0x42   :  { %4137 = vmatpush3.bf16.msra.mxu1 %v4337_v25 }
  0x43   :  { %4138 = vmatprep.subr.bf16.mxu1 %v4339_v45 }
  0x44   :  { %3936 = vmatpush3.bf16.msra.mxu0 %v4338_v35 }
  0x46   :  { %4139 = vmatpush3.bf16.msra.mxu1 %v4339_v45 }
  0x47   :  { %3569 = vmatmul.mubr.msk.bf16.vlgmr.msra.gmra.mrb[0].mxu0 %vm4852_vm5, %v3568_v50  ;;  %3962 = vmatprep.subr.bf16.mxu1 %v4341_v60 }
  0x48   :  { %353 = vmatprep.mubr.bf16.mxu0 %v112_v53 }
  0x49   :  { %4141 = vmatmul.mubr.msk.bf16.vlgmr.msra.gmra.mrb[0].mxu1 %vm4882_vm8, %v3580_v55 }
  0x4a   :  { %3963 = vmatpush3.bf16.msra.mxu1 %v4342_v61 }
  0x4b   :  { %3964 = vmatprep.subr.bf16.mxu1 %v4343_v62 }
  0x4e   :  { %3965 = vmatpush3.bf16.msra.mxu1 %v4344_v63 }
  0x4f   :  { %3573 = vmatmul.mubr.msk.bf16.gmra.mrb[4].mxu0 %vm4891_vm10, %v3572_v58  ;;  %3966 = vmatprep.subr.bf16.mxu1 %v4346_v0 }
  0x50   :  { %488 = vmatprep.mubr.bf16.mxu0 %v4706_v59 }
  0x52   :  { %3967 = vmatpush3.bf16.msra.mxu1 %v4347_v1 }
  0x53   :  { %3968 = vmatprep.subr.bf16.mxu1 %v4349_v2 }
  0x56   :  { %3969 = vmatpush3.bf16.msra.mxu1 %v4350_v3  ;;  %v4340_v3 = vld [vmem:[%s5533_s1 + $0x180] sm:$0xff]  }
  0x57   :  { %3970 = vmatprep.subr.bf16.mxu1 %v4352_v4  ;;  %v4707_v4 = vmov 0.0  }
  0x5a   :  { %3971 = vmatpush3.bf16.msra.mxu1 %v4353_v5  ;;  %v4345_v5 = vld [vmem:[%s5533_s1 + $0x140] sm:$0xff]  }
  0x5b   :  { %3972 = vmatprep.subr.bf16.mxu1 %v4355_v6  ;;  %v4348_v6 = vld [vmem:[%s5533_s1 + $0x148] sm:$0xff]  }
  0x5e   :  { %3973 = vmatpush3.bf16.msra.mxu1 %v4356_v7  ;;  %v4351_v7 = vld [vmem:[%s5533_s1 + $0x150] sm:$0xff]  }
  0x5f   :  { %3974 = vmatprep.subr.bf16.mxu1 %v4358_v8  ;;  %v4354_v8 = vld [vmem:[%s5533_s1 + $0x158] sm:$0xff]  }
 0x11a   :  { %v3937_v9 = vpop.f32.mrb[0].mxu0 }
 0x11b   :  { %v3938_v10 = vpop.f32.mrb[1].mxu0 }
 0x11c   :  { %v3939_v12 = vadd.f32 %v3938_v10, %v3937_v9  ;;  %v3940_v13 = vpop.f32.mrb[2].mxu0  ;;  %v4142_v15 = vpop.f32.mrb[0].mxu1  ;;  %v4357_v9 = vld [vmem:[%s5533_s1 + $0x160] sm:$0xff]   ;;  %v4359_v10 = vld [vmem:[%s5533_s1 + $0xf0] sm:$0xff]  }
 0x11d   :  { %v3941_v14 = vpop.f32.mrb[3].mxu0  ;;  %v396_v19 = vpop.f32.mrb[1].mxu1  ;;  %3975 = vmatpush3.bf16.msra.mxu1 %v4359_v10  ;;  %v4371_v10 = vld [vmem:[%s5533_s1 + $0x198] sm:$0xff]  }
 0x11e   :  { %v3942_v16 = vadd.f32 %v3941_v14, %v3940_v13  ;;  %v348_v18 = vadd.f32 %v3939_v12, %v3541_v11  ;;  %v4143_v21 = vpop.f32.mrb[2].mxu1  ;;  %v4361_v12 = vld [vmem:[%s5533_s1 + $0x138] sm:$0xff]   ;;  %v4363_v14 = vld [vmem:[%s5533_s1 + $0x170] sm:$0xff]  }
 0x11f   :  { %v399_v24 = vpop.f32.mrb[3].mxu1  ;;  %v4362_v13 = vld [vmem:[%s5533_s1 + $0xf8] sm:$0xff]   ;;  %3976 = vmatprep.subr.bf16.mxu1 %v4361_v12  ;;  %v4373_v12 = vld [vmem:[%s5533_s1 + $0x1e0] sm:$0xff]  }
 0x120   :  { %v397_v22 = vadd.f32 %v396_v19, %v348_v18  ;;  %v351_v23 = vadd.f32 %v3942_v16, %v3541_v11 }
 0x121   :  { %3977 = vmatpush3.bf16.msra.mxu1 %v4362_v13  ;;  %v4374_v13 = vld [vmem:[%s5533_s1 + $0x1a0] sm:$0xff]  }
 0x122   :  { %v411_v25 = vmax.f32 %v397_v22, 0.0  ;;  %v400_v26 = vadd.f32 %v399_v24, %v351_v23  ;;  %v3943_v27 = vpop.f32.mrb[4].mxu0 }
 0x123   :  { %v3944_v28 = vpop.f32.mrb[5].mxu0 }
 0x124   :  { %v412_v29 = vmax.f32 %v400_v26, 0.0  ;;  %v3945_v30 = vadd.f32 %v3944_v28, %v3943_v27  ;;  %v3946_v31 = vpop.f32.mrb[6].mxu0  ;;  %v415_v32 = vrot.slane %v411_v25, 7  ;;  %v423_v33 = vrot.slane %v411_v25, 1 }
 0x125   :  { %v3947_v35 = vpop.f32.mrb[7].mxu0 }
 0x126   :  { %v416_v36 = vrot.slane %v412_v29, 7  ;;  %v424_v37 = vrot.slane %v412_v29, 1  ;;  %v356_v38 = vadd.f32 %v3945_v30, %v3541_v11  ;;  %v3948_v39 = vadd.f32 %v3947_v35, %v3946_v31  ;;  %v3601_v31 = vld [vmem:[%s5536_s4 + $0x1] ss:$0 sm:$0xff] }
 0x127   :  { %v4950_v40 = vpack.c.bf16 %v412_v29, %v411_v25 }
 0x128   :  { %v421_v42 = vsel %vm62_vm1, %v415_v32, %v416_v36  ;;  %v429_v43 = vsel %vm71_vm2, %v423_v33, %v424_v37  ;;  %v405_v44 = vadd.f32 %v4142_v15, %v356_v38  ;;  %v359_v45 = vadd.f32 %v3948_v39, %v3541_v11  ;;  %v4360_v11 = vld [vmem:[%s5533_s1 + $0x168] sm:$0xff]   ;;  %v4364_v15 = vld [vmem:[%s5533_s1 + $0x178] sm:$0xff]  }
 0x129   :  { %456 = vmatprep.subr.bf16.mxu0 %v4950_v40 }
 0x12a   :  { %v413_v46 = vmax.f32 %v405_v44, 0.0  ;;  %v408_v47 = vadd.f32 %v4143_v21, %v359_v45 }
 0x12c   :  { %v417_v49 = vrot.slane %v413_v46, 7  ;;  %v425_v50 = vrot.slane %v413_v46, 1  ;;  %v414_v51 = vmax.f32 %v408_v47, 0.0 }
 0x12e   :  { %v418_v52 = vrot.slane %v414_v51, 7  ;;  %v426_v53 = vrot.slane %v414_v51, 1  ;;  %v4957_v55 = vpack.c.bf16 %v414_v51, %v413_v46  ;;  %v420_v56 = vsel %vm62_vm1, %v416_v36, %v417_v49 }
 0x12f   :  { %v428_v57 = vsel %vm71_vm2, %v424_v37, %v425_v50 }
 0x130   :  { %v422_v58 = vsel %vm62_vm1, %v418_v52, %v415_v32  ;;  %v419_v60 = vsel %vm62_vm1, %v417_v49, %v418_v52  ;;  %v3594_v61 = vpack.c.bf16 %v428_v57, %v429_v43  ;;  %v427_v62 = vsel %vm71_vm2, %v425_v50, %v426_v53  ;;  %v4490_v57 = vld [vmem:[%s5533_s1 + $0x338] sm:$0xff]  }
 0x131   :  { %v3585_v63 = vpack.c.bf16 %v421_v42, %v422_v58  ;;  %v3589_v0 = vpack.c.bf16 %v419_v60, %v420_v56  ;;  %v430_v1 = vsel %vm71_vm2, %v426_v53, %v423_v33 }
 0x132   :  { %v3598_v2 = vpack.c.bf16 %v430_v1, %v427_v62 }
 0x133   :  { %3586 = vmatpush1.bf16.msk.msra.mxu0 %vm4852_vm5, %v3585_v63  ;;  %v4365_v63 = vld [vmem:[%s5533_s1 + $0x1c8] sm:$0xff]  }
 0x134   :  { %458 = vmatprep.subr.bf16.mxu0 %v4957_v55 }
 0x137   :  { %3590 = vmatpush1.bf16.msk.msra.mxu0 %vm4891_vm10, %v3589_v0 }
 0x138   :  { %4144 = vmatprep.subr.bf16.mxu0 %v4707_v4 }
 0x13a   :  { %3591 = vmatmul.mubr.msk.bf16.vlgmr.msra.gmra.mrb[8].mxu0 %vm452_vm11, %v4340_v3 }
 0x13b   :  { %4145 = vmatpush3.bf16.msk.msra.mxu0 %vm4867_vm7, %v3594_v61  ;;  %4148 = vmatprep.mubr.msk.bf16.mxu0 %vm4708_vm12, %v4707_v4 }
 0x13c   :  { %4146 = vmatprep.subr.bf16.mxu0 %v4707_v4 }
 0x13f   :  { %4147 = vmatpush3.bf16.msk.msra.mxu0 %vm4882_vm8, %v3598_v2  ;;  %v849_v2 = vld [vmem:[%s5533_s1 + $0x248] sm:$0xf] }
 0x140   :  { %4152 = vmatprep.subr.bf16.mxu0 %v4707_v4 }
 0x142   :  { %4149 = vmatmul.mubr.msk.bf16.vlgmr.msra.gmra.mrb[12].mxu0 %vm452_vm11, %v4340_v3  ;;  %v4366_v3 = vld [vmem:[%s5533_s1 + $0x188] sm:$0xff]  }
 0x143   :  { %4153 = vmatpush3.bf16.msra.mxu0 %v4345_v5  ;;  %4168 = vmatprep.mubr.msk.bf16.mxu0 %vm4708_vm12, %v4707_v4  ;;  %v4369_v5 = vld [vmem:[%s5533_s1 + $0x208] sm:$0xff]  }
 0x144   :  { %4154 = vmatprep.subr.bf16.mxu0 %v4707_v4 }
 0x147   :  { %4155 = vmatpush3.bf16.msra.mxu0 %v4348_v6  ;;  %v4367_v6 = vld [vmem:[%s5533_s1 + $0x1d0] sm:$0xff]  }
 0x148   :  { %4156 = vmatprep.subr.bf16.mxu0 %v4707_v4 }
 0x14b   :  { %4157 = vmatpush3.bf16.msra.mxu0 %v4351_v7  ;;  %v4368_v7 = vld [vmem:[%s5533_s1 + $0x190] sm:$0xff]  }
 0x14c   :  { %4158 = vmatprep.subr.bf16.mxu0 %v4707_v4 }
 0x14f   :  { %4159 = vmatpush3.bf16.msra.mxu0 %v4354_v8  ;;  %v4372_v8 = vld [vmem:[%s5533_s1 + $0x210] sm:$0xff]  }
 0x150   :  { %4160 = vmatprep.subr.bf16.mxu0 %v4707_v4 }
 0x153   :  { %4161 = vmatpush3.bf16.msra.mxu0 %v4357_v9  ;;  %v4370_v9 = vld [vmem:[%s5533_s1 + $0x1d8] sm:$0xff]  }
 0x154   :  { %4162 = vmatprep.subr.bf16.mxu0 %v4707_v4 }
 0x157   :  { %4163 = vmatpush3.bf16.msra.mxu0 %v4360_v11  ;;  %v4375_v11 = vld [vmem:[%s5533_s1 + $0x218] sm:$0xff]  }
 0x158   :  { %4164 = vmatprep.subr.bf16.mxu0 %v4707_v4 }
 0x15b   :  { %4165 = vmatpush3.bf16.msra.mxu0 %v4363_v14  ;;  %v4378_v14 = vld [vmem:[%s5533_s1 + $0x220] sm:$0xff]  }
 0x15c   :  { %4166 = vmatprep.subr.bf16.mxu0 %v4707_v4 }
 0x15f   :  { %4167 = vmatpush3.bf16.msra.mxu0 %v4364_v15  ;;  %v4376_v15 = vld [vmem:[%s5533_s1 + $0x1e8] sm:$0xff]  }
 0x160   :  { %4172 = vmatprep.subr.bf16.mxu0 %v4707_v4 }
 0x20d   :  { %v490_v16 = vpop.f32.mrb[8].mxu0 }
 0x20e   :  { %v492_v18 = vpop.f32.mrb[9].mxu0 }
 0x20f   :  { %v494_v19 = vpop.f32.mrb[10].mxu0 }
 0x210   :  { %v540_v21 = vpack.c.bf16 %v494_v19, %v490_v16  ;;  %v496_v22 = vpop.f32.mrb[11].mxu0  ;;  %v4377_v16 = vld [vmem:[%s5533_s1 + $0x1a8] sm:$0xff]   ;;  %v4379_v19 = vld [vmem:[%s5533_s1 + $0x1f0] sm:$0xff]  }
 0x211   :  { %v541_v23 = vpack.c.bf16 %v496_v22, %v492_v18  ;;  %v4381_v18 = vld [vmem:[%s5533_s1 + $0x228] sm:$0xff]   ;;  %v4384_v22 = vld [vmem:[%s5533_s1 + $0x230] sm:$0xff]  }
 0x213   :  { %774 = vmatprep.mubr.bf16.mxu1 %v541_v23  ;;  %v4382_v23 = vld [vmem:[%s5533_s1 + $0x1f8] sm:$0xff]  }
 0x214   :  { %775 = vmatmul.mubr.bf16.vlgmr.msra.gmra.mrb[4].mxu1 %v540_v21  ;;  %v4380_v21 = vld [vmem:[%s5533_s1 + $0x1b0] sm:$0xff]  }
 0x215   :  { %v533_v24 = vpop.f32.mrb[12].mxu0  ;;  %886 = vmatprep.mubr.bf16.mxu1 %v4706_v59 }
 0x216   :  { %v4150_v25 = vpop.f32.mrb[13].mxu0 }
 0x217   :  { %v536_v26 = vpop.f32.mrb[14].mxu0  ;;  %v4387_v25 = vld [vmem:[%s5533_s1 + $0x238] sm:$0xff]  }
 0x218   :  { %v542_v27 = vpack.c.bf16 %v536_v26, %v533_v24  ;;  %v4151_v28 = vpop.f32.mrb[15].mxu0  ;;  %v4383_v24 = vld [vmem:[%s5533_s1 + $0x1b8] sm:$0xff]   ;;  %v4385_v26 = vld [vmem:[%s5533_s1 + $0x200] sm:$0xff]  }
 0x219   :  { %v4388_v28 = vld [vmem:[%s5533_s1 + $0x240] sm:$0xff]  }
 0x21a   :  { %4169 = vmatmul.mubr.bf16.vlgmr.msra.gmra.mrb[16].mxu0 %v542_v27  ;;  %v4386_v27 = vld [vmem:[%s5533_s1 + $0x1c0] sm:$0xff]  }
 0x21b   :  { %4174 = vmatprep.mubr.msk.bf16.mxu0 %vm4708_vm12, %v4707_v4 }
 0x2e7   :  { %v3978_v29 = vpop.f32.mrb[4].mxu1 }
 0x2e8   :  { %v3979_v30 = vpop.f32.mrb[5].mxu1 }
 0x2e9   :  { %v3980_v32 = vadd.f32 %v3979_v30, %v3978_v29  ;;  %v3981_v33 = vpop.f32.mrb[6].mxu1  ;;  %v4391_v29 = vld [vmem:[#allocation2 + $0x4] ss:$8 sps:$4 sm:$0xff]  }
 0x2ea   :  { %v3982_v35 = vpop.f32.mrb[7].mxu1 }
 0x2eb   :  { %v3983_v36 = vadd.f32 %v3982_v35, %v3981_v33  ;;  %v777_v37 = vadd.f32 %v3980_v32, %v3601_v31 }
 0x2ed   :  { %v817_v38 = vpop.f32.mrb[16].mxu0  ;;  %v780_v39 = vadd.f32 %v3983_v36, %v3601_v31 }
 0x2ee   :  { %v818_v42 = vadd.f32 %v817_v38, %v777_v37  ;;  %v4170_v43 = vpop.f32.mrb[17].mxu0 }
 0x2ef   :  { %v820_v44 = vpop.f32.mrb[18].mxu0 }
 0x2f0   :  { %v824_v45 = vmax.f32 %v818_v42, 0.0  ;;  %v821_v46 = vadd.f32 %v820_v44, %v780_v39  ;;  %v4171_v47 = vpop.f32.mrb[19].mxu0  ;;  %v4389_v39 = vld [vmem:[#allocation2] ss:$8 sps:$4 sm:$0xff]  }
 0x2f1   :  { %v4397_v47 = vld [vmem:[#allocation2 + $0x24] ss:$8 sps:$4 sm:$0xff]  }
 0x2f2   :  { %v825_v49 = vmax.f32 %v821_v46, 0.0  ;;  %v826_v50 = vrot.slane %v824_v45, 7  ;;  %v830_v51 = vrot.slane %v824_v45, 1  ;;  %v4392_v46 = vld [vmem:[#allocation2 + $0x10] ss:$8 sps:$4 sm:$0xff]  }
 0x2f4   :  { %v827_v52 = vrot.slane %v825_v49, 7  ;;  %v831_v53 = vrot.slane %v825_v49, 1  ;;  %v5039_v56 = vpack.c.bf16 %v825_v49, %v824_v45  ;;  %v4394_v45 = vld [vmem:[#allocation2 + $0x14] ss:$8 sps:$4 sm:$0xff]   ;;  %v4395_v49 = vld [vmem:[#allocation2 + $0x20] ss:$8 sps:$4 sm:$0xff]  }
 0x2f6   :  { %v828_v58 = vsel %vm62_vm1, %v826_v50, %v827_v52  ;;  %v829_v60 = vsel %vm62_vm1, %v827_v52, %v826_v50  ;;  %v832_v61 = vsel %vm71_vm2, %v830_v51, %v831_v53  ;;  %v833_v62 = vsel %vm71_vm2, %v831_v53, %v830_v51  ;;  %854 = vmatprep.subr.bf16.mxu1 %v5039_v56  ;;  %v4400_v50 = vld [vmem:[#allocation2 + $0x34] ss:$8 sps:$4 sm:$0xff]   ;;  %v4398_v51 = vld [vmem:[#allocation2 + $0x30] ss:$8 sps:$4 sm:$0xff]   ;;  %v4403_v52 = vld [vmem:[#allocation2 + $0x44] ss:$8 sps:$4 sm:$0xff]  }
 0x2f7   :  { %v3629_v0 = vpack.c.bf16 %v828_v58, %v829_v60  ;;  %v3635_v1 = vpack.c.bf16 %v833_v62, %v832_v61  ;;  %v4401_v53 = vld [vmem:[#allocation2 + $0x40] ss:$8 sps:$4 sm:$0xff]   ;;  %v4406_v58 = vld [vmem:[#allocation2 + $0x54] ss:$8 sps:$4 sm:$0xff]   ;;  %v4404_v60 = vld [vmem:[#allocation2 + $0x50] ss:$8 sps:$4 sm:$0xff]  }
 0x2f8   :  { %v4407_v61 = vld [vmem:[#allocation2 + $0x60] ss:$8 sps:$4 sm:$0xff]   ;;  %v4409_v62 = vld [vmem:[#allocation2 + $0x64] ss:$8 sps:$4 sm:$0xff]  }
 0x2f9   :  { %3630 = vmatpush1.bf16.msk.msra.mxu1 %vm5058_vm3, %v3629_v0  ;;  %4173 = vmatpush3.bf16.msk.msra.mxu0 %vm5043_vm15, %v3635_v1  ;;  %v4410_v0 = vld [vmem:[#allocation2 + $0x70] ss:$8 sps:$4 sm:$0xff]  }
 0x2fa   :  { %3995 = vmatprep.subr.bf16.mxu1 %v4365_v63  ;;  %4178 = vmatprep.subr.bf16.mxu0 %v4707_v4  ;;  %v4412_v63 = vld [vmem:[#allocation2 + $0x74] ss:$8 sps:$4 sm:$0xff]  }
 0x2fc   :  { %3631 = vmatmul.mubr.msk.bf16.vlgmr.msra.gmra.mrb[8].mxu1 %vm850_vm0, %v849_v2  ;;  %4175 = vmatmul.mubr.msk.bf16.vlgmr.msra.gmra.mrb[20].mxu0 %vm850_vm0, %v849_v2 }
 0x2fd   :  { %3996 = vmatpush3.bf16.msra.mxu1 %v4366_v3  ;;  %4179 = vmatpush3.bf16.msra.mxu0 %v4369_v5 }
 0x2fe   :  { %3997 = vmatprep.subr.bf16.mxu1 %v4367_v6  ;;  %4180 = vmatprep.subr.bf16.mxu0 %v4707_v4 }
 0x2ff   :  { %4194 = vmatprep.mubr.msk.bf16.mxu0 %vm4708_vm12, %v4707_v4 }
 0x301   :  { %3998 = vmatpush3.bf16.msra.mxu1 %v4368_v7  ;;  %4181 = vmatpush3.bf16.msra.mxu0 %v4372_v8  ;;  %v3638_v7 = vld [vmem:[%s5536_s4 + $0x2] ss:$0 sm:$0xff] }
 0x302   :  { %3999 = vmatprep.subr.bf16.mxu1 %v4370_v9  ;;  %4182 = vmatprep.subr.bf16.mxu0 %v4707_v4 }
 0x305   :  { %4000 = vmatpush3.bf16.msra.mxu1 %v4371_v10  ;;  %4183 = vmatpush3.bf16.msra.mxu0 %v4375_v11 }
 0x306   :  { %4001 = vmatprep.subr.bf16.mxu1 %v4373_v12  ;;  %4184 = vmatprep.subr.bf16.mxu0 %v4707_v4 }
 0x309   :  { %4002 = vmatpush3.bf16.msra.mxu1 %v4374_v13  ;;  %4185 = vmatpush3.bf16.msra.mxu0 %v4378_v14 }
 0x30a   :  { %4003 = vmatprep.subr.bf16.mxu1 %v4376_v15  ;;  %4186 = vmatprep.subr.bf16.mxu0 %v4707_v4 }
 0x30d   :  { %4004 = vmatpush3.bf16.msra.mxu1 %v4377_v16  ;;  %4187 = vmatpush3.bf16.msra.mxu0 %v4381_v18 }
 0x30e   :  { %4005 = vmatprep.subr.bf16.mxu1 %v4379_v19  ;;  %4188 = vmatprep.subr.bf16.mxu0 %v4707_v4 }
 0x311   :  { %4006 = vmatpush3.bf16.msra.mxu1 %v4380_v21  ;;  %4189 = vmatpush3.bf16.msra.mxu0 %v4384_v22 }
 0x312   :  { %4007 = vmatprep.subr.bf16.mxu1 %v4382_v23  ;;  %4190 = vmatprep.subr.bf16.mxu0 %v4707_v4 }
 0x315   :  { %4008 = vmatpush3.bf16.msra.mxu1 %v4383_v24  ;;  %4191 = vmatpush3.bf16.msra.mxu0 %v4387_v25  ;;  %v4413_v25 = vld [vmem:[%s5533_s1 + $0x258] sm:$0xff]  }
 0x316   :  { %4009 = vmatprep.subr.bf16.mxu1 %v4385_v26  ;;  %4192 = vmatprep.subr.bf16.mxu0 %v4707_v4  ;;  %v4417_v26 = vld [vmem:[#allocation2 + $0x84] ss:$8 sps:$4 sm:$0xff]  }
 0x319   :  { %4010 = vmatpush3.bf16.msra.mxu1 %v4386_v27  ;;  %4193 = vmatpush3.bf16.msra.mxu0 %v4388_v28  ;;  %v4414_v28 = vld [vmem:[%s5533_s1 + $0x250] sm:$0xff]  }
 0x31a   :  { %4198 = vmatprep.subr.bf16.mxu0 %v4707_v4  ;;  %1315 = vmatprep.subr.bf16.mxu1 %v4391_v29  ;;  %v4415_v29 = vld [vmem:[#allocation2 + $0x80] ss:$8 sps:$4 sm:$0xff]  }
 0x3cf   :  { %v888_v30 = vpop.f32.mrb[8].mxu1  ;;  %v929_v31 = vpop.f32.mrb[20].mxu0 }
 0x3d0   :  { %v890_v32 = vpop.f32.mrb[9].mxu1  ;;  %v937_v33 = vpack.c.bf16 %v929_v31, %v929_v31  ;;  %v4176_v35 = vpop.f32.mrb[21].mxu0  ;;  %v935_v42 = vpack.c.bf16 %v888_v30, %v888_v30  ;;  %v4420_v30 = vld [vmem:[#allocation2 + $0x94] ss:$8 sps:$4 sm:$0xff]   ;;  %v4418_v31 = vld [vmem:[#allocation2 + $0x90] ss:$8 sps:$4 sm:$0xff]  }
 0x3d1   :  { %v936_v36 = vpack.c.bf16 %v890_v32, %v890_v32  ;;  %v892_v37 = vpop.f32.mrb[10].mxu1  ;;  %v932_v38 = vpop.f32.mrb[22].mxu0  ;;  %v4423_v32 = vld [vmem:[#allocation2 + $0xa4] ss:$8 sps:$4 sm:$0xff]   ;;  %v4426_v35 = vld [vmem:[#allocation2 + $0xb4] ss:$8 sps:$4 sm:$0xff]  }
 0x3d2   :  { %v893_v43 = vpop.f32.mrb[11].mxu1  ;;  %4195 = vmatmul.mubr.bf16.vlgmr.msra.gmra.mrb[24].mxu0 %v937_v33  ;;  %v4177_v44 = vpop.f32.mrb[23].mxu0  ;;  %v4421_v33 = vld [vmem:[#allocation2 + $0xa0] ss:$8 sps:$4 sm:$0xff]   ;;  %v4429_v37 = vld [vmem:[#allocation2 + $0xc4] ss:$8 sps:$4 sm:$0xff]  }
 0x3d3   :  { %1169 = vmatprep.mubr.bf16.mxu1 %v936_v36  ;;  %4200 = vmatprep.mubr.msk.bf16.mxu0 %vm4708_vm12, %v4707_v4  ;;  %v4424_v36 = vld [vmem:[#allocation2 + $0xb0] ss:$8 sps:$4 sm:$0xff]   ;;  %v4427_v38 = vld [vmem:[#allocation2 + $0xc0] ss:$8 sps:$4 sm:$0xff]   ;;  %v4438_v44 = vld [vmem:[#allocation2 + $0xf4] ss:$8 sps:$4 sm:$0xff]  }
 0x3d4   :  { %1170 = vmatmul.mubr.bf16.vlgmr.msra.gmra.mrb[12].mxu1 %v935_v42  ;;  %v4430_v42 = vld [vmem:[#allocation2 + $0xd0] ss:$8 sps:$4 sm:$0xff]   ;;  %v4433_v43 = vld [vmem:[#allocation2 + $0xe0] ss:$8 sps:$4 sm:$0xff]  }
 0x3d5   :  { %1316 = vmatpush1.bf16.msra.mxu1 %v4389_v39  ;;  %1347 = vmatprep.mubr.bf16.mxu1 %v4706_v59  ;;  %v4432_v39 = vld [vmem:[#allocation2 + $0xd4] ss:$8 sps:$4 sm:$0xff]  }
 0x3d6   :  { %1317 = vmatprep.subr.bf16.mxu1 %v4394_v45  ;;  %v4436_v45 = vld [vmem:[#allocation2 + $0xf0] ss:$8 sps:$4 sm:$0xff]  }
 0x3d9   :  { %1318 = vmatpush1.bf16.msra.mxu1 %v4392_v46  ;;  %v4441_v46 = vld [vmem:[#allocation2 + $0x104] ss:$8 sps:$4 sm:$0xff]  }
 0x3da   :  { %1319 = vmatprep.subr.bf16.mxu1 %v4397_v47  ;;  %v4439_v47 = vld [vmem:[#allocation2 + $0x100] ss:$8 sps:$4 sm:$0xff]  }
 0x3dd   :  { %1320 = vmatpush1.bf16.msra.mxu1 %v4395_v49  ;;  %v4444_v49 = vld [vmem:[#allocation2 + $0x114] ss:$8 sps:$4 sm:$0xff]  }
 0x3de   :  { %1321 = vmatprep.subr.bf16.mxu1 %v4400_v50  ;;  %v4442_v50 = vld [vmem:[#allocation2 + $0x110] ss:$8 sps:$4 sm:$0xff]  }
 0x3e1   :  { %1322 = vmatpush1.bf16.msra.mxu1 %v4398_v51  ;;  %v4447_v51 = vld [vmem:[#allocation2 + $0x124] ss:$8 sps:$4 sm:$0xff]  }
 0x3e2   :  { %1323 = vmatprep.subr.bf16.mxu1 %v4403_v52  ;;  %v4445_v52 = vld [vmem:[#allocation2 + $0x120] ss:$8 sps:$4 sm:$0xff]  }
 0x3e5   :  { %1324 = vmatpush1.bf16.msra.mxu1 %v4401_v53  ;;  %v4450_v53 = vld [vmem:[#allocation2 + $0x134] ss:$8 sps:$4 sm:$0xff]  }
 0x3e6   :  { %1325 = vmatprep.subr.bf16.mxu1 %v4406_v58  ;;  %v4448_v58 = vld [vmem:[#allocation2 + $0x130] ss:$8 sps:$4 sm:$0xff]  }
 0x3e9   :  { %1326 = vmatpush1.bf16.msra.mxu1 %v4404_v60  ;;  %v4451_v60 = vld [vmem:[#allocation2 + $0x140] ss:$8 sps:$4 sm:$0xff]  }
 0x3ea   :  { %1327 = vmatprep.subr.bf16.mxu1 %v4409_v62  ;;  %v4454_v62 = vld [vmem:[#allocation2 + $0x150] ss:$8 sps:$4 sm:$0xff]  }
 0x3ed   :  { %1328 = vmatpush1.bf16.msra.mxu1 %v4407_v61  ;;  %v4453_v61 = vld [vmem:[#allocation2 + $0x144] ss:$8 sps:$4 sm:$0xff]  }
 0x3ee   :  { %1329 = vmatprep.subr.bf16.mxu1 %v4412_v63  ;;  %v4456_v63 = vld [vmem:[#allocation2 + $0x154] ss:$8 sps:$4 sm:$0xff]  }
 0x3f1   :  { %1330 = vmatpush1.bf16.msra.mxu1 %v4410_v0  ;;  %v4459_v0 = vld [vmem:[#allocation2 + $0x164] ss:$8 sps:$4 sm:$0xff]  }
 0x4a5   :  { %v1211_v1 = vpop.f32.mrb[24].mxu0 }
 0x4a6   :  { %v4196_v2 = vpop.f32.mrb[25].mxu0 }
 0x4a7   :  { %v4011_v3 = vpop.f32.mrb[12].mxu1  ;;  %v1214_v5 = vpop.f32.mrb[26].mxu0  ;;  %v4462_v2 = vld [vmem:[#allocation2 + $0x174] ss:$8 sps:$4 sm:$0xff]  }
 0x4a8   :  { %v4012_v6 = vpop.f32.mrb[13].mxu1  ;;  %v4197_v8 = vpop.f32.mrb[27].mxu0  ;;  %v4463_v5 = vld [vmem:[%s5533_s1 + $0x2a0] sm:$0xff]  }
 0x4a9   :  { %v4013_v9 = vadd.f32 %v4012_v6, %v4011_v3  ;;  %v4014_v10 = vpop.f32.mrb[14].mxu1  ;;  %v4460_v3 = vld [vmem:[#allocation2 + $0x170] ss:$8 sps:$4 sm:$0xff]   ;;  %v4464_v6 = vld [vmem:[%s5533_s1 + $0x260] sm:$0xff]   ;;  %4030 = vmatprep.subr.bf16.mxu1 %v4463_v5  ;;  %v4466_v8 = vld [vmem:[%s5533_s1 + $0x268] sm:$0xff]  }
 0x4aa   :  { %v4015_v11 = vpop.f32.mrb[15].mxu1  ;;  %v4468_v10 = vld [vmem:[%s5533_s1 + $0x270] sm:$0xff]   ;;  %v4480_v5 = vld [vmem:[%s5533_s1 + $0x2e8] sm:$0xff]  }
 0x4ab   :  { %v1172_v12 = vadd.f32 %v4013_v9, %v3638_v7  ;;  %v4465_v7 = vld [vmem:[%s5533_s1 + $0x2a8] sm:$0xff]   ;;  %v4467_v9 = vld [vmem:[%s5533_s1 + $0x2b0] sm:$0xff]   ;;  %v4469_v11 = vld [vmem:[%s5533_s1 + $0x2b8] sm:$0xff]  }
 0x4ad   :  { %v1212_v13 = vadd.f32 %v1211_v1, %v1172_v12  ;;  %v4457_v1 = vld [vmem:[#allocation2 + $0x160] ss:$8 sps:$4 sm:$0xff]   ;;  %v4470_v12 = vld [vmem:[%s5533_s1 + $0x278] sm:$0xff]  }
 0x4af   :  { %v1217_v14 = vmax.f32 %v1212_v13, 0.0  ;;  %v4471_v13 = vld [vmem:[%s5533_s1 + $0x2c0] sm:$0xff]  }
 0x4b1   :  { %v1218_v15 = vpack.c.bf16 %v1217_v14, %v1217_v14  ;;  %v4472_v14 = vld [vmem:[%s5533_s1 + $0x280] sm:$0xff]  }
 0x4b3   :  { %1348 = vmatmul.mubr.bf16.vlgmr.msra.gmra.mrb[16].mxu1 %v1218_v15  ;;  %v4473_v15 = vld [vmem:[%s5533_s1 + $0x2c8] sm:$0xff]  }
 0x4b4   :  { %4031 = vmatpush3.bf16.msra.mxu1 %v4464_v6  ;;  %v4481_v6 = vld [vmem:[%s5533_s1 + $0x2f0] sm:$0xff]  }
 0x4b5   :  { %4032 = vmatprep.subr.bf16.mxu1 %v4465_v7  ;;  %v4483_v7 = vld [vmem:[%s5533_s1 + $0x300] sm:$0xff]  }
 0x4b8   :  { %4033 = vmatpush3.bf16.msra.mxu1 %v4466_v8  ;;  %v4484_v8 = vld [vmem:[%s5533_s1 + $0x308] sm:$0xff]  }
 0x4b9   :  { %4034 = vmatprep.subr.bf16.mxu1 %v4467_v9  ;;  %v4485_v9 = vld [vmem:[%s5533_s1 + $0x310] sm:$0xff]  }
 0x4bc   :  { %4035 = vmatpush3.bf16.msra.mxu1 %v4468_v10  ;;  %v4486_v10 = vld [vmem:[%s5533_s1 + $0x318] sm:$0xff]  }
 0x4bd   :  { %4036 = vmatprep.subr.bf16.mxu1 %v4469_v11  ;;  %v4487_v11 = vld [vmem:[%s5533_s1 + $0x320] sm:$0xff]  }
 0x4c0   :  { %4037 = vmatpush3.bf16.msra.mxu1 %v4470_v12  ;;  %v4488_v12 = vld [vmem:[%s5533_s1 + $0x328] sm:$0xff]  }
 0x4c1   :  { %4038 = vmatprep.subr.bf16.mxu1 %v4471_v13  ;;  %v4489_v13 = vld [vmem:[%s5533_s1 + $0x330] sm:$0xff]  }
 0x4c4   :  { %4039 = vmatpush3.bf16.msra.mxu1 %v4472_v14  ;;  %v4491_v14 = vld [vmem:[%s5533_s1 + $0x340] sm:$0xff]  }
 0x4c5   :  { %4040 = vmatprep.subr.bf16.mxu1 %v4473_v15  ;;  %v4492_v15 = vld [vmem:[%s5533_s1 + $0x348] sm:$0xff]  }
 0x586   :  { %v1349_v16 = vpop.f32.mrb[16].mxu1 }
 0x587   :  { %v1351_v18 = vpop.f32.mrb[17].mxu1  ;;  %v1358_v23 = vpack.c.bf16 %v1349_v16, %v1349_v16 }
 0x588   :  { %v1361_v19 = vpack.c.bf16 %v1351_v18, %v1351_v18  ;;  %v1353_v21 = vpop.f32.mrb[18].mxu1 }
 0x589   :  { %v1354_v22 = vpop.f32.mrb[19].mxu1  ;;  %v1425_v27 = vsel %vm1371_vm4, %v1358_v23, 0 }
 0x58a   :  { %v1373_v24 = vsel %vm1371_vm4, %v1361_v19, 0 }
 0x58b   :  { %4199 = vmatpush3.bf16.msra.mxu0 %v1373_v24 }
 0x58c   :  { %4204 = vmatprep.subr.bf16.mxu0 %v4707_v4 }
 0x58e   :  { %4201 = vmatmul.mubr.msk.bf16.vlgmr.msra.gmra.mrb[28].mxu0 %vm1367_vm6, %v4413_v25  ;;  %v3683_v25 = vld [vmem:[%s5536_s4 + $0x3] ss:$0 sm:$0xff] }
 0x58f   :  { %4205 = vmatpush3.bf16.msra.mxu0 %v1425_v27  ;;  %4206 = vmatprep.mubr.msk.bf16.mxu0 %vm4708_vm12, %v4707_v4 }
 0x590   :  { %1682 = vmatprep.subr.bf16.mxu0 %v4417_v26 }
 0x596   :  { %4207 = vmatmul.mubr.msk.bf16.vlgmr.msra.gmra.mrb[32].mxu0 %vm1367_vm6, %v4414_v28 }
 0x597   :  { %1714 = vmatprep.mubr.bf16.mxu0 %v5039_v56  ;;  %1683 = vmatpush1.bf16.msra.mxu0 %v4415_v29  ;;  %v4435_v56 = vld [vmem:[#allocation2 + $0xe4] ss:$8 sps:$4 sm:$0xff]  }
 0x598   :  { %1684 = vmatprep.subr.bf16.mxu0 %v4420_v30 }
 0x59b   :  { %1685 = vmatpush1.bf16.msra.mxu0 %v4418_v31 }
 0x59c   :  { %1686 = vmatprep.subr.bf16.mxu0 %v4423_v32  ;;  %v4474_v32 = vld [vmem:[%s5533_s1 + $0x288] sm:$0xff]  }
 0x59d   :  { %4041 = vmatpush3.bf16.msra.mxu1 %v4474_v32 }
 0x59f   :  { %1687 = vmatpush1.bf16.msra.mxu0 %v4421_v33  ;;  %v4475_v33 = vld [vmem:[%s5533_s1 + $0x2d0] sm:$0xff]  }
 0x5a0   :  { %1688 = vmatprep.subr.bf16.mxu0 %v4426_v35  ;;  %v4476_v35 = vld [vmem:[%s5533_s1 + $0x290] sm:$0xff]   ;;  %4042 = vmatprep.subr.bf16.mxu1 %v4475_v33 }
 0x5a1   :  { %4043 = vmatpush3.bf16.msra.mxu1 %v4476_v35 }
 0x5a3   :  { %1689 = vmatpush1.bf16.msra.mxu0 %v4424_v36  ;;  %v4477_v36 = vld [vmem:[%s5533_s1 + $0x2d8] sm:$0xff]  }
 0x5a4   :  { %1690 = vmatprep.subr.bf16.mxu0 %v4429_v37  ;;  %v4478_v37 = vld [vmem:[%s5533_s1 + $0x298] sm:$0xff]   ;;  %4044 = vmatprep.subr.bf16.mxu1 %v4477_v36 }
 0x5a5   :  { %4045 = vmatpush3.bf16.msra.mxu1 %v4478_v37 }
 0x5a6   :  { %4210 = vmatprep.subr.bf16.mxu1 %v4707_v4 }
 0x5a7   :  { %1691 = vmatpush1.bf16.msra.mxu0 %v4427_v38  ;;  %v5226_v38 = vsub.s32 0, %v4811_v17 }
 0x5a8   :  { %1692 = vmatprep.subr.bf16.mxu0 %v4432_v39  ;;  %v5231_v39 = vld [vmem:[%s5536_s4 + $0x4] sm:$0x3] }
 0x5ab   :  { %1693 = vmatpush1.bf16.msra.mxu0 %v4430_v42  ;;  %v1515_v42 = vrot.slane %v5231_v39, %v5226_v38 }
 0x5ac   :  { %1694 = vmatprep.subr.bf16.mxu0 %v4435_v56 }
 0x5af   :  { %1695 = vmatpush1.bf16.msra.mxu0 %v4433_v43 }
 0x5b0   :  { %1696 = vmatprep.subr.bf16.mxu0 %v4438_v44 }
 0x5b3   :  { %1697 = vmatpush1.bf16.msra.mxu0 %v4436_v45 }
 0x5b4   :  { %1698 = vmatprep.subr.bf16.mxu0 %v4441_v46 }
 0x5b7   :  { %1699 = vmatpush1.bf16.msra.mxu0 %v4439_v47 }
 0x5b8   :  { %1700 = vmatprep.subr.bf16.mxu0 %v4444_v49 }
 0x5bb   :  { %1701 = vmatpush1.bf16.msra.mxu0 %v4442_v50 }
 0x5bc   :  { %1702 = vmatprep.subr.bf16.mxu0 %v4447_v51 }
 0x5bf   :  { %1703 = vmatpush1.bf16.msra.mxu0 %v4445_v52 }
 0x5c0   :  { %1704 = vmatprep.subr.bf16.mxu0 %v4450_v53 }
 0x5c3   :  { %1705 = vmatpush1.bf16.msra.mxu0 %v4448_v58 }
 0x5c4   :  { %1706 = vmatprep.subr.bf16.mxu0 %v4453_v61 }
 0x5c7   :  { %1707 = vmatpush1.bf16.msra.mxu0 %v4451_v60 }
 0x5c8   :  { %1708 = vmatprep.subr.bf16.mxu0 %v4456_v63 }
 0x5cb   :  { %1709 = vmatpush1.bf16.msra.mxu0 %v4454_v62 }
 0x5cc   :  { %1710 = vmatprep.subr.bf16.mxu0 %v4459_v0 }
 0x5cf   :  { %1711 = vmatpush1.bf16.msra.mxu0 %v4457_v1  ;;  %v4479_v1 = vld [vmem:[%s5533_s1 + $0x2e0] sm:$0xff]  }
 0x5d0   :  { %1712 = vmatprep.subr.bf16.mxu0 %v4462_v2 }
 0x5d3   :  { %1713 = vmatpush1.bf16.msra.mxu0 %v4460_v3 }
 0x5d4   :  { %4230 = vmatprep.subr.bf16.mxu0 %v4707_v4 }
 0x661   :  { %v1409_v16 = vpop.f32.mrb[28].mxu0 }
 0x662   :  { %v4202_v18 = vpop.f32.mrb[29].mxu0 }
 0x663   :  { %v1412_v19 = vpop.f32.mrb[30].mxu0  ;;  %v4494_v18 = vld [vmem:[%s5533_s1 + $0x358] sm:$0xff]  }
 0x664   :  { %v4203_v21 = vpop.f32.mrb[31].mxu0 }
 0x665   :  { %v4497_v21 = vld [vmem:[#allocation2 + $0x184] ss:$8 sps:$4 sm:$0xff]  }
 0x669   :  { %v1461_v22 = vpop.f32.mrb[32].mxu0 }
 0x66a   :  { %v1462_v23 = vadd.f32 %v1461_v22, %v1409_v16  ;;  %v4208_v24 = vpop.f32.mrb[33].mxu0  ;;  %v4493_v16 = vld [vmem:[%s5533_s1 + $0x350] sm:$0xff]  }
 0x66b   :  { %v1464_v26 = vpop.f32.mrb[34].mxu0  ;;  %v4500_v22 = vld [vmem:[#allocation2 + $0x194] ss:$8 sps:$4 sm:$0xff]   ;;  %v4503_v24 = vld [vmem:[#allocation2 + $0x1a4] ss:$8 sps:$4 sm:$0xff]  }
 0x66c   :  { %v1465_v27 = vadd.f32 %v1464_v26, %v1412_v19  ;;  %v4209_v28 = vpop.f32.mrb[35].mxu0  ;;  %v1475_v29 = vadd.f32 %v3683_v25, %v1462_v23  ;;  %v4495_v19 = vld [vmem:[#allocation2 + $0x180] ss:$8 sps:$4 sm:$0xff]   ;;  %v4498_v23 = vld [vmem:[#allocation2 + $0x190] ss:$8 sps:$4 sm:$0xff]  }
 0x66d   :  { %v4506_v26 = vld [vmem:[#allocation2 + $0x1b4] ss:$8 sps:$4 sm:$0xff]   ;;  %v4507_v28 = vld [vmem:[#allocation2 + $0x1c0] ss:$8 sps:$4 sm:$0xff]  }
 0x66e   :  { %v1476_v30 = vadd.f32 %v3683_v25, %v1465_v27  ;;  %v4501_v25 = vld [vmem:[#allocation2 + $0x1a0] ss:$8 sps:$4 sm:$0xff]   ;;  %v4504_v27 = vld [vmem:[#allocation2 + $0x1b0] ss:$8 sps:$4 sm:$0xff]  }
 0x670   :  { %v1477_v31 = vpack.c.bf16 %v1476_v30, %v1475_v29  ;;  %v4512_v29 = vld [vmem:[#allocation2 + $0x1d4] ss:$8 sps:$4 sm:$0xff]   ;;  %v4510_v30 = vld [vmem:[#allocation2 + $0x1d0] ss:$8 sps:$4 sm:$0xff]  }
 0x672   :  { %1715 = vmatmul.mubr.bf16.vlgmr.msra.gmra.mrb[36].mxu0 %v1477_v31 }
 0x673   :  { %4246 = vmatprep.mubr.msk.bf16.mxu0 %vm4708_vm12, %v4707_v4  ;;  %4231 = vmatpush3.bf16.msra.mxu0 %v4487_v11 }
 0x674   :  { %4232 = vmatprep.subr.bf16.mxu0 %v4707_v4 }
 0x677   :  { %4233 = vmatpush3.bf16.msra.mxu0 %v4488_v12 }
 0x678   :  { %4234 = vmatprep.subr.bf16.mxu0 %v4707_v4 }
 0x67b   :  { %4235 = vmatpush3.bf16.msra.mxu0 %v4489_v13 }
 0x67c   :  { %4236 = vmatprep.subr.bf16.mxu0 %v4707_v4 }
 0x67f   :  { %4237 = vmatpush3.bf16.msra.mxu0 %v4490_v57 }
 0x680   :  { %4238 = vmatprep.subr.bf16.mxu0 %v4707_v4 }
 0x683   :  { %4239 = vmatpush3.bf16.msra.mxu0 %v4491_v14 }
 0x684   :  { %4240 = vmatprep.subr.bf16.mxu0 %v4707_v4 }
 0x687   :  { %4241 = vmatpush3.bf16.msra.mxu0 %v4492_v15 }
 0x688   :  { %4242 = vmatprep.subr.bf16.mxu0 %v4707_v4 }
 0x68b   :  { %4243 = vmatpush3.bf16.msra.mxu0 %v4493_v16  ;;  %v4525_v16 = vld [vmem:[#allocation2 + $0x204] ss:$8 sps:$4 sm:$0xff]  }
 0x68c   :  { %4244 = vmatprep.subr.bf16.mxu0 %v4707_v4 }
 0x68f   :  { %4245 = vmatpush3.bf16.msra.mxu0 %v4494_v18  ;;  %v4528_v18 = vld [vmem:[#allocation2 + $0x214] ss:$8 sps:$4 sm:$0xff]  }
 0x745   :  { %v1716_v56 = vpop.f32.mrb[36].mxu0 }
 0x746   :  { %v1717_v43 = vadd.f32 %v1716_v56, %v1515_v42  ;;  %v5235_v44 = vpop.f32.mrb[37].mxu0 }
 0x747   :  { %v1720_v45 = vpop.f32.mrb[38].mxu0 }
 0x748   :  { %v1725_v46 = vmax.f32 %v1717_v43, 0.0  ;;  %v1721_v47 = vadd.f32 %v1720_v45, %v1515_v42  ;;  %v5237_v49 = vpop.f32.mrb[39].mxu0  ;;  %v3716_v42 = vld [vmem:[%s5536_s4 + $0x6] ss:$0 sm:$0xff] }
 0x74a   :  { %v1726_v50 = vmax.f32 %v1721_v47, 0.0  ;;  %v1727_v51 = vrot.slane %v1725_v46, 7  ;;  %v1731_v52 = vrot.slane %v1725_v46, 1 }
 0x74c   :  { %v1728_v53 = vrot.slane %v1726_v50, 7  ;;  %v1732_v58 = vrot.slane %v1726_v50, 1  ;;  %v1740_v60 = vpack.c.bf16 %v1726_v50, %v1725_v46 }
 0x74e   :  { %v1729_v61 = vsel %vm62_vm1, %v1727_v51, %v1728_v53  ;;  %v1730_v62 = vsel %vm62_vm1, %v1728_v53, %v1727_v51  ;;  %v1733_v63 = vsel %vm71_vm2, %v1731_v52, %v1732_v58  ;;  %v1734_v0 = vsel %vm71_vm2, %v1732_v58, %v1731_v52  ;;  %1973 = vmatprep.mubr.bf16.mxu1 %v1740_v60 }
 0x74f   :  { %v3744_v2 = vpack.c.bf16 %v1729_v61, %v1730_v62  ;;  %v3749_v3 = vpack.c.bf16 %v1734_v0, %v1733_v63  ;;  %v4515_v61 = vld [vmem:[#allocation2 + $0x1e4] ss:$8 sps:$4 sm:$0xff]   ;;  %v4513_v62 = vld [vmem:[#allocation2 + $0x1e0] ss:$8 sps:$4 sm:$0xff]   ;;  %v4518_v63 = vld [vmem:[#allocation2 + $0x1f4] ss:$8 sps:$4 sm:$0xff]  }
 0x750   :  { %v4516_v0 = vld [vmem:[#allocation2 + $0x1f0] ss:$8 sps:$4 sm:$0xff]  }
 0x751   :  { %3745 = vmatmul.mubr.msk.bf16.vlgmr.msra.gmra.mrb[20].mxu1 %vm5058_vm3, %v3744_v2 }
 0x752   :  { %4211 = vmatpush3.bf16.msra.mxu1 %v4479_v1  ;;  %4226 = vmatprep.mubr.msk.bf16.mxu1 %vm4708_vm12, %v4707_v4  ;;  %v5320_v1 = vsub.s32 1, %v4811_v17 }
 0x753   :  { %4212 = vmatprep.subr.bf16.mxu1 %v4707_v4 }
 0x754   :  { %v1519_v2 = vrot.slane %v5231_v39, %v5320_v1  ;;  %v4519_v39 = vld [vmem:[%s5533_s1 + $0x370] sm:$0xff]  }
 0x756   :  { %4213 = vmatpush3.bf16.msra.mxu1 %v4480_v5 }
 0x757   :  { %4214 = vmatprep.subr.bf16.mxu1 %v4707_v4 }
 0x75a   :  { %4215 = vmatpush3.bf16.msra.mxu1 %v4481_v6  ;;  %v1719_v6 = vadd.f32 %v5235_v44, %v1519_v2  ;;  %v4523_v44 = vld [vmem:[#allocation2 + $0x200] ss:$8 sps:$4 sm:$0xff]  }
 0x75b   :  { %4216 = vmatprep.subr.bf16.mxu1 %v4707_v4 }
 0x75e   :  { %4217 = vmatpush3.bf16.msra.mxu1 %v4482_v20 }
 0x75f   :  { %4218 = vmatprep.subr.bf16.mxu1 %v4707_v4 }
 0x762   :  { %4219 = vmatpush3.bf16.msra.mxu1 %v4483_v7 }
 0x763   :  { %4220 = vmatprep.subr.bf16.mxu1 %v4707_v4 }
 0x766   :  { %4221 = vmatpush3.bf16.msra.mxu1 %v4484_v8 }
 0x767   :  { %4222 = vmatprep.subr.bf16.mxu1 %v4707_v4 }
 0x76a   :  { %4223 = vmatpush3.bf16.msra.mxu1 %v4485_v9  ;;  %v1723_v9 = vadd.f32 %v5237_v49, %v1519_v2  ;;  %v4526_v49 = vld [vmem:[#allocation2 + $0x210] ss:$8 sps:$4 sm:$0xff]   ;;  %v4570_v2 = vld [vmem:[#allocation2 + $0x2f4] ss:$8 sps:$4 sm:$0xff]  }
 0x76b   :  { %4224 = vmatprep.subr.bf16.mxu1 %v4707_v4  ;;  %v4509_v4 = vld [vmem:[#allocation2 + $0x1c4] ss:$8 sps:$4 sm:$0xff]  }
 0x76e   :  { %4225 = vmatpush3.bf16.msra.mxu1 %v4486_v10 }
 0x76f   :  { %2239 = vmatprep.subr.bf16.mxu1 %v4497_v21  ;;  %v4529_v21 = vld [vmem:[#allocation2 + $0x220] ss:$8 sps:$4 sm:$0xff]  }
 0x771   :  { %4227 = vmatmul.mubr.msk.bf16.vlgmr.msra.gmra.mrb[24].mxu1 %vm5043_vm15, %v3749_v3  ;;  %v3751_v3 = vld [vmem:[%s5536_s4 + $0x7] ss:$0 sm:$0xff] }
 0x772   :  { %2271 = vmatprep.mubr.bf16.mxu1 %v4706_v59  ;;  %2240 = vmatpush1.bf16.msra.mxu1 %v4495_v19  ;;  %v4531_v19 = vld [vmem:[#allocation2 + $0x224] ss:$8 sps:$4 sm:$0xff]  }
 0x773   :  { %2241 = vmatprep.subr.bf16.mxu1 %v4500_v22  ;;  %v4534_v22 = vld [vmem:[#allocation2 + $0x234] ss:$8 sps:$4 sm:$0xff]  }
 0x776   :  { %2242 = vmatpush1.bf16.msra.mxu1 %v4498_v23  ;;  %v4537_v23 = vld [vmem:[#allocation2 + $0x244] ss:$8 sps:$4 sm:$0xff]  }
 0x777   :  { %2243 = vmatprep.subr.bf16.mxu1 %v4503_v24  ;;  %v4535_v24 = vld [vmem:[#allocation2 + $0x240] ss:$8 sps:$4 sm:$0xff]  }
 0x77a   :  { %2244 = vmatpush1.bf16.msra.mxu1 %v4501_v25  ;;  %v4540_v25 = vld [vmem:[#allocation2 + $0x254] ss:$8 sps:$4 sm:$0xff]  }
 0x77b   :  { %2245 = vmatprep.subr.bf16.mxu1 %v4506_v26  ;;  %v4538_v26 = vld [vmem:[#allocation2 + $0x250] ss:$8 sps:$4 sm:$0xff]  }
 0x77e   :  { %2246 = vmatpush1.bf16.msra.mxu1 %v4504_v27  ;;  %v4543_v27 = vld [vmem:[#allocation2 + $0x264] ss:$8 sps:$4 sm:$0xff]  }
 0x77f   :  { %2247 = vmatprep.subr.bf16.mxu1 %v4509_v4  ;;  %v4541_v4 = vld [vmem:[#allocation2 + $0x260] ss:$8 sps:$4 sm:$0xff]  }
 0x782   :  { %2248 = vmatpush1.bf16.msra.mxu1 %v4507_v28  ;;  %v4546_v28 = vld [vmem:[#allocation2 + $0x274] ss:$8 sps:$4 sm:$0xff]  }
 0x783   :  { %2249 = vmatprep.subr.bf16.mxu1 %v4512_v29  ;;  %v4544_v29 = vld [vmem:[#allocation2 + $0x270] ss:$8 sps:$4 sm:$0xff]  }
 0x786   :  { %2250 = vmatpush1.bf16.msra.mxu1 %v4510_v30  ;;  %v4549_v30 = vld [vmem:[#allocation2 + $0x284] ss:$8 sps:$4 sm:$0xff]  }
 0x787   :  { %2251 = vmatprep.subr.bf16.mxu1 %v4515_v61  ;;  %v4521_v61 = vld [vmem:[%s5533_s1 + $0x360] sm:$0xff]  }
 0x78a   :  { %2252 = vmatpush1.bf16.msra.mxu1 %v4513_v62  ;;  %v4522_v62 = vld [vmem:[%s5533_s1 + $0x368] sm:$0xff]  }
 0x78b   :  { %2253 = vmatprep.subr.bf16.mxu1 %v4518_v63  ;;  %v4567_v63 = vld [vmem:[#allocation2 + $0x2e4] ss:$8 sps:$4 sm:$0xff]  }
 0x78e   :  { %2254 = vmatpush1.bf16.msra.mxu1 %v4516_v0  ;;  %v4565_v0 = vld [vmem:[#allocation2 + $0x2e0] ss:$8 sps:$4 sm:$0xff]  }
 0x78f   :  { %2639 = vmatprep.subr.bf16.mxu1 %v4525_v16 }
 0x824   :  { %v4046_v31 = vpop.f32.mrb[20].mxu1 }
 0x825   :  { %v4047_v32 = vpop.f32.mrb[21].mxu1 }
 0x826   :  { %v4048_v33 = vadd.f32 %v4047_v32, %v4046_v31  ;;  %v4049_v35 = vpop.f32.mrb[22].mxu1  ;;  %v4547_v31 = vld [vmem:[#allocation2 + $0x280] ss:$8 sps:$4 sm:$0xff]   ;;  %v4552_v32 = vld [vmem:[#allocation2 + $0x294] ss:$8 sps:$4 sm:$0xff]  }
 0x827   :  { %v4050_v36 = vpop.f32.mrb[23].mxu1 }
 0x828   :  { %v4051_v37 = vadd.f32 %v4050_v36, %v4049_v35  ;;  %v1976_v56 = vadd.f32 %v4048_v33, %v3716_v42  ;;  %v4550_v33 = vld [vmem:[#allocation2 + $0x290] ss:$8 sps:$4 sm:$0xff]   ;;  %v4555_v35 = vld [vmem:[#allocation2 + $0x2a4] ss:$8 sps:$4 sm:$0xff]   ;;  %v4553_v36 = vld [vmem:[#allocation2 + $0x2a0] ss:$8 sps:$4 sm:$0xff]  }
 0x82a   :  { %v1979_v47 = vadd.f32 %v4051_v37, %v3716_v42  ;;  %v4558_v37 = vld [vmem:[#allocation2 + $0x2b4] ss:$8 sps:$4 sm:$0xff]   ;;  %v4556_v42 = vld [vmem:[#allocation2 + $0x2b0] ss:$8 sps:$4 sm:$0xff]  }
 0x844   :  { %v2016_v43 = vpop.f32.mrb[24].mxu1 }
 0x845   :  { %v2017_v45 = vadd.f32 %v2016_v43, %v1976_v56  ;;  %v4228_v46 = vpop.f32.mrb[25].mxu1  ;;  %v4561_v56 = vld [vmem:[#allocation2 + $0x2c4] ss:$8 sps:$4 sm:$0xff]   ;;  %v4559_v43 = vld [vmem:[#allocation2 + $0x2c0] ss:$8 sps:$4 sm:$0xff]  }
 0x846   :  { %v2019_v50 = vpop.f32.mrb[26].mxu1  ;;  %v4562_v46 = vld [vmem:[#allocation2 + $0x2d0] ss:$8 sps:$4 sm:$0xff]  }
 0x847   :  { %v2020_v51 = vadd.f32 %v2019_v50, %v1979_v47  ;;  %v4229_v52 = vpop.f32.mrb[27].mxu1  ;;  %v2023_v53 = vmax.f32 %v2017_v45, 0.0  ;;  %v4564_v45 = vld [vmem:[#allocation2 + $0x2d4] ss:$8 sps:$4 sm:$0xff]  }
 0x849   :  { %v2024_v58 = vmax.f32 %v2020_v51, 0.0 }
 0x84b   :  { %v2025_v60 = vpack.c.bf16 %v2024_v58, %v2023_v53 }
 0x84d   :  { %4247 = vmatmul.mubr.bf16.vlgmr.msra.gmra.mrb[40].mxu0 %v2025_v60  ;;  %v4520_v60 = vld [vmem:[%s5533_s1 + $0x378] sm:$0xff]  }
 0x84e   :  { %4252 = vmatprep.mubr.msk.bf16.mxu0 %vm850_vm0, %v4519_v39 }
 0x920   :  { %v2131_v5 = vpop.f32.mrb[40].mxu0 }
 0x921   :  { %v2132_v20 = vadd.f32 %v3751_v3, %v2131_v5  ;;  %v4248_v7 = vpop.f32.mrb[41].mxu0  ;;  %v4571_v5 = vld [vmem:[%s5533_s1 + $0x3c0] sm:$0xff]  }
 0x922   :  { %v2134_v8 = vpop.f32.mrb[42].mxu0  ;;  %v4574_v7 = vld [vmem:[%s5533_s1 + $0x388] sm:$0xff]  }
 0x923   :  { %v2138_v10 = vadd.f32 %v2132_v20, %v1719_v6  ;;  %v2135_v11 = vadd.f32 %v3751_v3, %v2134_v8  ;;  %v4249_v12 = vpop.f32.mrb[43].mxu0  ;;  %v4568_v3 = vld [vmem:[#allocation2 + $0x2f0] ss:$8 sps:$4 sm:$0xff]   ;;  %v4572_v6 = vld [vmem:[%s5533_s1 + $0x380] sm:$0xff]   ;;  %v4573_v20 = vld [vmem:[%s5533_s1 + $0x3c8] sm:$0xff]  }
 0x924   :  { %v4575_v8 = vld [vmem:[%s5533_s1 + $0x3d0] sm:$0xff]   ;;  %v3784_v12 = vld [vmem:[%s5536_s4 + $0x8] ss:$0 sm:$0xff] }
 0x925   :  { %v2139_v13 = vadd.f32 %v2135_v11, %v1723_v9  ;;  %v2140_v57 = vmax.f32 %v2138_v10, 0.0  ;;  %v4576_v9 = vld [vmem:[%s5533_s1 + $0x390] sm:$0xff]   ;;  %v4577_v10 = vld [vmem:[%s5533_s1 + $0x3d8] sm:$0xff]  }
 0x927   :  { %v2141_v14 = vmax.f32 %v2139_v13, 0.0 }
 0x929   :  { %v2142_v15 = vpack.c.bf16 %v2141_v14, %v2140_v57 }
 0x92b   :  { %2272 = vmatmul.mubr.bf16.vlgmr.msra.gmra.mrb[28].mxu1 %v2142_v15 }
 0x92c   :  { %2671 = vmatprep.mubr.bf16.mxu1 %v4950_v40  ;;  %2640 = vmatpush1.bf16.msra.mxu1 %v4523_v44  ;;  %v4532_v40 = vld [vmem:[#allocation2 + $0x230] ss:$8 sps:$4 sm:$0xff]  }
 0x92d   :  { %2641 = vmatprep.subr.bf16.mxu1 %v4528_v18 }
 0x930   :  { %2642 = vmatpush1.bf16.msra.mxu1 %v4526_v49 }
 0x931   :  { %2643 = vmatprep.subr.bf16.mxu1 %v4531_v19  ;;  %v4578_v19 = vld [vmem:[%s5533_s1 + $0x398] sm:$0xff]  }
 0x934   :  { %2644 = vmatpush1.bf16.msra.mxu1 %v4529_v21  ;;  %v4579_v21 = vld [vmem:[%s5533_s1 + $0x3e0] sm:$0xff]  }
 0x935   :  { %2645 = vmatprep.subr.bf16.mxu1 %v4534_v22  ;;  %v4580_v22 = vld [vmem:[%s5533_s1 + $0x3a0] sm:$0xff]  }
 0x938   :  { %2646 = vmatpush1.bf16.msra.mxu1 %v4532_v40  ;;  %v4582_v40 = vld [vmem:[%s5533_s1 + $0x3a8] sm:$0xff]  }
 0x939   :  { %2647 = vmatprep.subr.bf16.mxu1 %v4537_v23  ;;  %v4583_v23 = vld [vmem:[%s5533_s1 + $0x3f0] sm:$0xff]  }
 0x93c   :  { %2648 = vmatpush1.bf16.msra.mxu1 %v4535_v24  ;;  %v4584_v24 = vld [vmem:[%s5533_s1 + $0x3b0] sm:$0xff]  }
 0x93d   :  { %2649 = vmatprep.subr.bf16.mxu1 %v4540_v25  ;;  %v4585_v25 = vld [vmem:[%s5533_s1 + $0x3f8] sm:$0xff]  }
 0x940   :  { %2650 = vmatpush1.bf16.msra.mxu1 %v4538_v26  ;;  %v4586_v26 = vld [vmem:[%s5533_s1 + $0x3b8] sm:$0xff]  }
 0x941   :  { %2651 = vmatprep.subr.bf16.mxu1 %v4543_v27  ;;  %v4587_v27 = vld [vmem:[%s5533_s1 + $0x400] sm:$0xff]  }
 0x944   :  { %2652 = vmatpush1.bf16.msra.mxu1 %v4541_v4  ;;  %v5404_v4 = vld [vmem:[%s5536_s4 + $0x9] sm:$0x3] }
 0x945   :  { %2653 = vmatprep.subr.bf16.mxu1 %v4546_v28  ;;  %v2472_v28 = vrot.slane %v5404_v4, %v5226_v38 }
 0x948   :  { %2654 = vmatpush1.bf16.msra.mxu1 %v4544_v29 }
 0x949   :  { %2655 = vmatprep.subr.bf16.mxu1 %v4549_v30 }
 0x94c   :  { %2656 = vmatpush1.bf16.msra.mxu1 %v4547_v31 }
 0x94d   :  { %2657 = vmatprep.subr.bf16.mxu1 %v4552_v32 }
 0x950   :  { %2658 = vmatpush1.bf16.msra.mxu1 %v4550_v33 }
 0x951   :  { %2659 = vmatprep.subr.bf16.mxu1 %v4555_v35 }
 0x954   :  { %2660 = vmatpush1.bf16.msra.mxu1 %v4553_v36 }
 0x955   :  { %2661 = vmatprep.subr.bf16.mxu1 %v4558_v37 }
 0x958   :  { %2662 = vmatpush1.bf16.msra.mxu1 %v4556_v42 }
 0x959   :  { %2663 = vmatprep.subr.bf16.mxu1 %v4561_v56 }
 0x95c   :  { %2664 = vmatpush1.bf16.msra.mxu1 %v4559_v43 }
 0x95d   :  { %2665 = vmatprep.subr.bf16.mxu1 %v4564_v45 }
 0x960   :  { %2666 = vmatpush1.bf16.msra.mxu1 %v4562_v46 }
 0x961   :  { %2667 = vmatprep.subr.bf16.mxu1 %v4567_v63 }
 0x964   :  { %2668 = vmatpush1.bf16.msra.mxu1 %v4565_v0 }
 0x965   :  { %2669 = vmatprep.subr.bf16.mxu1 %v4570_v2 }
 0x968   :  { %2670 = vmatpush1.bf16.msra.mxu1 %v4568_v3 }
 0x9fe   :  { %v2273_v47 = vpop.f32.mrb[28].mxu1 }
 0x9ff   :  { %v2275_v50 = vpop.f32.mrb[29].mxu1 }
 0xa00   :  { %v2277_v51 = vpop.f32.mrb[30].mxu1 }
 0xa01   :  { %v2286_v52 = vpack.c.bf16 %v2277_v51, %v2273_v47  ;;  %v2279_v53 = vpop.f32.mrb[31].mxu1 }
 0xa02   :  { %v2291_v58 = vpack.c.bf16 %v2279_v53, %v2275_v50 }
 0xa04   :  { %4250 = vmatprep.subr.bf16.mxu0 %v2291_v58 }
 0xa05   :  { %4251 = vmatpush3.bf16.msra.mxu0 %v2291_v58 }
 0xa06   :  { %4256 = vmatprep.subr.bf16.mxu0 %v2286_v52 }
 0xa08   :  { %4253 = vmatmul.mubr.msk.bf16.vlgmr.msra.gmra.mrb[44].mxu0 %vm850_vm0, %v4520_v60 }
 0xa09   :  { %4257 = vmatpush3.bf16.msra.mxu0 %v2286_v52  ;;  %4258 = vmatprep.mubr.msk.bf16.mxu0 %vm850_vm0, %v4521_v61 }
 0xa0a   :  { %4076 = vmatprep.subr.bf16.mxu0 %v4571_v5 }
 0xa14   :  { %4259 = vmatmul.mubr.msk.bf16.vlgmr.msra.gmra.mrb[44].mxu0 %vm850_vm0, %v4522_v62 }
 0xa15   :  { %4077 = vmatpush3.bf16.msra.mxu0 %v4572_v6 }
 0xa16   :  { %4078 = vmatprep.subr.bf16.mxu0 %v4573_v20 }
 0xa19   :  { %4079 = vmatpush3.bf16.msra.mxu0 %v4574_v7 }
 0xa1a   :  { %4080 = vmatprep.subr.bf16.mxu0 %v4575_v8 }
 0xa1d   :  { %4081 = vmatpush3.bf16.msra.mxu0 %v4576_v9 }
 0xa1e   :  { %4082 = vmatprep.subr.bf16.mxu0 %v4577_v10 }
 0xa21   :  { %4083 = vmatpush3.bf16.msra.mxu0 %v4578_v19  ;;  %v4597_v19 = vld [vmem:[%s5533_s1 + $0x450] sm:$0xff]  }
 0xa22   :  { %4084 = vmatprep.subr.bf16.mxu0 %v4579_v21  ;;  %v4599_v21 = vld [vmem:[%s5533_s1 + $0x460] sm:$0xff]  }
 0xa25   :  { %4085 = vmatpush3.bf16.msra.mxu0 %v4580_v22  ;;  %v4600_v22 = vld [vmem:[%s5533_s1 + $0x468] sm:$0xff]  }
 0xae7   :  { %v4260_v11 = vpop.f32.mrb[44].mxu0 }
 0xae8   :  { %v2407_v13 = vpop.f32.mrb[45].mxu0  ;;  %v2431_v14 = vadd.f32 %v4260_v11, %v3784_v12 }
 0xae9   :  { %v4261_v57 = vpop.f32.mrb[46].mxu0  ;;  %v2429_v44 = vadd.f32 %v3784_v12, %v2407_v13 }
 0xaea   :  { %v2432_v15 = vadd.f32 %v4261_v57, %v3784_v12  ;;  %v2410_v39 = vpop.f32.mrb[47].mxu0  ;;  %v4588_v57 = vld [vmem:[%s5533_s1 + $0x408] sm:$0xff]  }
 0xaeb   :  { %v2430_v16 = vadd.f32 %v3784_v12, %v2410_v39  ;;  %v4589_v39 = vld [vmem:[%s5533_s1 + $0x410] sm:$0xff]  }
 0xaec   :  { %v2434_v18 = vpack.c.bf16 %v2432_v15, %v2431_v14 }
 0xaed   :  { %v2433_v49 = vpack.c.bf16 %v2430_v16, %v2429_v44  ;;  %v4590_v44 = vld [vmem:[%s5533_s1 + $0x418] sm:$0xff]   ;;  %v4592_v16 = vld [vmem:[%s5533_s1 + $0x428] sm:$0xff]  }
 0xaef   :  { %2672 = vmatmul.mubr.bf16.vlgmr.msra.gmra.mrb[32].mxu1 %v2433_v49  ;;  %v4596_v49 = vld [vmem:[%s5533_s1 + $0x448] sm:$0xff]  }
 0xaf0   :  { %2681 = vmatprep.mubr.bf16.mxu1 %v4957_v55  ;;  %v4581_v55 = vld [vmem:[%s5533_s1 + $0x3e8] sm:$0xff]  }
 0xaf1   :  { %4086 = vmatprep.subr.bf16.mxu0 %v4581_v55  ;;  %v4601_v55 = vld [vmem:[%s5533_s1 + $0x470] sm:$0xff]  }
 0xaf2   :  { %4087 = vmatpush3.bf16.msra.mxu0 %v4582_v40  ;;  %v4602_v40 = vld [vmem:[%s5533_s1 + $0x478] sm:$0xff]  }
 0xaf3   :  { %4088 = vmatprep.subr.bf16.mxu0 %v4583_v23  ;;  %v4603_v23 = vld [vmem:[#allocation4] ss:$16 sps:$4 sm:$0xff]  }
 0xaf6   :  { %4089 = vmatpush3.bf16.msra.mxu0 %v4584_v24  ;;  %v4605_v24 = vld [vmem:[#allocation4 + $0x4] ss:$16 sps:$4 sm:$0xff]  }
 0xaf7   :  { %2682 = vmatmul.mubr.bf16.gmra.mrb[36].mxu1 %v2434_v18  ;;  %4090 = vmatprep.subr.bf16.mxu0 %v4585_v25  ;;  %v4595_v18 = vld [vmem:[%s5533_s1 + $0x440] sm:$0xff]   ;;  %v4608_v25 = vld [vmem:[#allocation4 + $0xc] ss:$16 sps:$4 sm:$0xff]  }
 0xaf8   :  { %4282 = vmatprep.subr.bf16.mxu1 %v4595_v18 }
 0xaf9   :  { %4283 = vmatpush3.bf16.msra.mxu1 %v4595_v18  ;;  %v4626_v18 = vld [vmem:[#allocation4 + $0x6c] ss:$16 sps:$4 sm:$0xff]  }
 0xafa   :  { %4091 = vmatpush3.bf16.msra.mxu0 %v4586_v26  ;;  %4284 = vmatprep.subr.bf16.mxu1 %v4596_v49  ;;  %v4611_v26 = vld [vmem:[#allocation4 + $0x24] ss:$16 sps:$4 sm:$0xff]  }
 0xafb   :  { %4262 = vmatprep.subr.bf16.mxu0 %v4587_v27 }
 0xafd   :  { %4285 = vmatpush3.bf16.msra.mxu1 %v4596_v49  ;;  %v4624_v49 = vld [vmem:[#allocation4 + $0x68] ss:$16 sps:$4 sm:$0xff]  }
 0xafe   :  { %4286 = vmatprep.subr.bf16.mxu1 %v4597_v19 }
 0xb01   :  { %4287 = vmatpush3.bf16.msra.mxu1 %v4597_v19  ;;  %v4632_v19 = vld [vmem:[#allocation4 + $0x8c] ss:$16 sps:$4 sm:$0xff]  }
 0xb02   :  { %4288 = vmatprep.subr.bf16.mxu1 %v4598_v48 }
 0xb05   :  { %4289 = vmatpush3.bf16.msra.mxu1 %v4598_v48  ;;  %v4630_v48 = vld [vmem:[#allocation4 + $0x88] ss:$16 sps:$4 sm:$0xff]  }
 0xb06   :  { %4290 = vmatprep.subr.bf16.mxu1 %v4599_v21 }
 0xb09   :  { %4291 = vmatpush3.bf16.msra.mxu1 %v4599_v21  ;;  %v4635_v21 = vld [vmem:[#allocation4 + $0xa4] ss:$16 sps:$4 sm:$0xff]  }
 0xb0a   :  { %4292 = vmatprep.subr.bf16.mxu1 %v4600_v22 }
 0xb0d   :  { %4293 = vmatpush3.bf16.msra.mxu1 %v4600_v22  ;;  %v4638_v22 = vld [vmem:[#allocation4 + $0xac] ss:$16 sps:$4 sm:$0xff]  }
 0xb0e   :  { %4294 = vmatprep.subr.bf16.mxu1 %v4601_v55 }
 0xb11   :  { %4295 = vmatpush3.bf16.msra.mxu1 %v4601_v55  ;;  %v4633_v55 = vld [vmem:[#allocation4 + $0xa0] ss:$16 sps:$4 sm:$0xff]  }
 0xb12   :  { %4296 = vmatprep.subr.bf16.mxu1 %v4602_v40 }
 0xb15   :  { %4297 = vmatpush3.bf16.msra.mxu1 %v4602_v40  ;;  %v4636_v40 = vld [vmem:[#allocation4 + $0xa8] ss:$16 sps:$4 sm:$0xff]  }
 0xb16   :  { %3426 = vmatprep.subr.bf16.mxu1 %v4608_v25  ;;  %v4639_v25 = vld [vmem:[#allocation4 + $0xc0] ss:$16 sps:$4 sm:$0xff]  }
 0xbc2   :  { %v2673_v29 = vpop.f32.mrb[32].mxu1 }
 0xbc3   :  { %v2674_v30 = vadd.f32 %v2673_v29, %v2472_v28  ;;  %v5408_v31 = vpop.f32.mrb[33].mxu1  ;;  %v4615_v29 = vld [vmem:[#allocation4 + $0x40] ss:$16 sps:$4 sm:$0xff]  }
 0xbc4   :  { %v2677_v32 = vpop.f32.mrb[34].mxu1 }
 0xbc5   :  { %v2692_v33 = vmax.f32 %v2674_v30, 0.0  ;;  %v2678_v35 = vadd.f32 %v2677_v32, %v2472_v28  ;;  %v5410_v36 = vpop.f32.mrb[35].mxu1  ;;  %v4623_v30 = vld [vmem:[#allocation4 + $0x64] ss:$16 sps:$4 sm:$0xff]   ;;  %v4621_v32 = vld [vmem:[#allocation4 + $0x60] ss:$16 sps:$4 sm:$0xff]  }
 0xbc7   :  { %v2693_v37 = vmax.f32 %v2678_v35, 0.0  ;;  %v2696_v42 = vrot.slane %v2692_v33, 7  ;;  %v2704_v56 = vrot.slane %v2692_v33, 1  ;;  %v4627_v35 = vld [vmem:[#allocation4 + $0x80] ss:$16 sps:$4 sm:$0xff]  }
 0xbc9   :  { %v2697_v43 = vrot.slane %v2693_v37, 7  ;;  %v2705_v45 = vrot.slane %v2693_v37, 1  ;;  %v2721_v46 = vpack.c.bf16 %v2693_v37, %v2692_v33  ;;  %v4629_v33 = vld [vmem:[#allocation4 + $0x84] ss:$16 sps:$4 sm:$0xff]  }
 0xbca   :  { %v2683_v47 = vpop.f32.mrb[36].mxu1 }
 0xbcb   :  { %v2702_v50 = vsel %vm62_vm1, %v2696_v42, %v2697_v43  ;;  %v2684_v51 = vadd.f32 %v2683_v47, %v2472_v28  ;;  %v5414_v52 = vpop.f32.mrb[37].mxu1  ;;  %2957 = vmatprep.mubr.bf16.mxu0 %v2721_v46  ;;  %v2710_v53 = vsel %vm71_vm2, %v2704_v56, %v2705_v45 }
 0xbcc   :  { %v2687_v58 = vpop.f32.mrb[38].mxu1 }
 0xbcd   :  { %v2694_v60 = vmax.f32 %v2684_v51, 0.0  ;;  %v2688_v61 = vadd.f32 %v2687_v58, %v2472_v28  ;;  %v5418_v62 = vpop.f32.mrb[39].mxu1  ;;  %v4617_v28 = vld [vmem:[#allocation4 + $0x44] ss:$16 sps:$4 sm:$0xff]  }
 0xbcf   :  { %v2698_v63 = vrot.slane %v2694_v60, 7  ;;  %v2706_v0 = vrot.slane %v2694_v60, 1  ;;  %v2695_v2 = vmax.f32 %v2688_v61, 0.0  ;;  %v3817_v61 = vld [vmem:[%s5536_s4 + $0xb] ss:$0 sm:$0xff] }
 0xbd1   :  { %v2699_v3 = vrot.slane %v2695_v2, 7  ;;  %v2707_v5 = vrot.slane %v2695_v2, 1  ;;  %v2724_v6 = vpack.c.bf16 %v2695_v2, %v2694_v60  ;;  %v2701_v20 = vsel %vm62_vm1, %v2697_v43, %v2698_v63 }
 0xbd2   :  { %v2709_v7 = vsel %vm71_vm2, %v2705_v45, %v2706_v0 }
 0xbd3   :  { %v2703_v8 = vsel %vm62_vm1, %v2699_v3, %v2696_v42  ;;  %v2708_v9 = vsel %vm71_vm2, %v2706_v0, %v2707_v5  ;;  %v2711_v10 = vsel %vm71_vm2, %v2707_v5, %v2704_v56  ;;  %v2700_v11 = vsel %vm62_vm1, %v2698_v63, %v2699_v3 }
 0xbd4   :  { %v3844_v12 = vpack.c.bf16 %v2702_v50, %v2703_v8  ;;  %v3856_v13 = vpack.c.bf16 %v2711_v10, %v2708_v9  ;;  %v3848_v14 = vpack.c.bf16 %v2700_v11, %v2701_v20  ;;  %v3852_v15 = vpack.c.bf16 %v2709_v7, %v2710_v53 }
 0xbd6   :  { %3845 = vmatmul.mubr.msk.bf16.vlgmr.msra.gmra.mrb[48].mxu0 %vm4852_vm5, %v3844_v12 }
 0xbd7   :  { %4263 = vmatpush3.bf16.msra.mxu0 %v4587_v27  ;;  %2965 = vmatprep.mubr.bf16.mxu0 %v2724_v6  ;;  %v4609_v27 = vld [vmem:[#allocation4 + $0x20] ss:$16 sps:$4 sm:$0xff]  }
 0xbd8   :  { %4264 = vmatprep.subr.bf16.mxu0 %v4588_v57 }
 0xbdb   :  { %4265 = vmatpush3.bf16.msra.mxu0 %v4588_v57 }
 0xbdc   :  { %4266 = vmatprep.subr.bf16.mxu0 %v4589_v39 }
 0xbde   :  { %3849 = vmatmul.mubr.msk.bf16.gmra.mrb[52].mxu0 %vm4891_vm10, %v3848_v14 }
 0xbdf   :  { %4267 = vmatpush3.bf16.msra.mxu0 %v4589_v39  ;;  %4278 = vmatprep.mubr.msk.bf16.mxu0 %vm4867_vm7, %v3852_v15 }
 0xbe0   :  { %4268 = vmatprep.subr.bf16.mxu0 %v4590_v44 }
 0xbe3   :  { %4269 = vmatpush3.bf16.msra.mxu0 %v4590_v44  ;;  %v4606_v44 = vld [vmem:[#allocation4 + $0x8] ss:$16 sps:$4 sm:$0xff]  }
 0xbe4   :  { %4270 = vmatprep.subr.bf16.mxu0 %v4591_v34 }
 0xbe7   :  { %4271 = vmatpush3.bf16.msra.mxu0 %v4591_v34  ;;  %v4614_v34 = vld [vmem:[#allocation4 + $0x2c] ss:$16 sps:$4 sm:$0xff]  }
 0xbe8   :  { %4272 = vmatprep.subr.bf16.mxu0 %v4592_v16 }
 0xbeb   :  { %4273 = vmatpush3.bf16.msra.mxu0 %v4592_v16  ;;  %v4612_v16 = vld [vmem:[#allocation4 + $0x28] ss:$16 sps:$4 sm:$0xff]  }
 0xbec   :  { %4274 = vmatprep.subr.bf16.mxu0 %v4593_v54 }
 0xbef   :  { %4275 = vmatpush3.bf16.msra.mxu0 %v4593_v54  ;;  %v4620_v54 = vld [vmem:[#allocation4 + $0x4c] ss:$16 sps:$4 sm:$0xff]  }
 0xbf0   :  { %4276 = vmatprep.subr.bf16.mxu0 %v4594_v41 }
 0xbf3   :  { %4277 = vmatpush3.bf16.msra.mxu0 %v4594_v41  ;;  %v4618_v41 = vld [vmem:[#allocation4 + $0x48] ss:$16 sps:$4 sm:$0xff]  }
 0xbf4   :  { %3373 = vmatprep.subr.bf16.mxu0 %v4605_v24  ;;  %v4644_v24 = vld [vmem:[#allocation4 + $0xcc] ss:$16 sps:$4 sm:$0xff]  }
 0xbf6   :  { %4279 = vmatmul.mubr.msk.bf16.vlgmr.msra.gmra.mrb[56].mxu0 %vm4882_vm8, %v3856_v13 }
 0xbf7   :  { %3405 = vmatprep.mubr.bf16.mxu0 %v4706_v59  ;;  %3374 = vmatpush1.bf16.msra.mxu0 %v4603_v23  ;;  %v4641_v23 = vld [vmem:[#allocation4 + $0xc4] ss:$16 sps:$4 sm:$0xff]  }
 0xbf8   :  { %3375 = vmatprep.subr.bf16.mxu0 %v4611_v26  ;;  %v4642_v26 = vld [vmem:[#allocation4 + $0xc8] ss:$16 sps:$4 sm:$0xff]  }
 0xbfb   :  { %3376 = vmatpush1.bf16.msra.mxu0 %v4609_v27  ;;  %v4647_v27 = vld [vmem:[#allocation4 + $0xe4] ss:$16 sps:$4 sm:$0xff]  }
 0xbfc   :  { %3377 = vmatprep.subr.bf16.mxu0 %v4617_v28  ;;  %v4650_v28 = vld [vmem:[#allocation4 + $0xec] ss:$16 sps:$4 sm:$0xff]  }
 0xbff   :  { %3378 = vmatpush1.bf16.msra.mxu0 %v4615_v29  ;;  %v4645_v29 = vld [vmem:[#allocation4 + $0xe0] ss:$16 sps:$4 sm:$0xff]  }
 0xc00   :  { %3379 = vmatprep.subr.bf16.mxu0 %v4623_v30  ;;  %v4648_v30 = vld [vmem:[#allocation4 + $0xe8] ss:$16 sps:$4 sm:$0xff]  }
 0xc03   :  { %3380 = vmatpush1.bf16.msra.mxu0 %v4621_v32  ;;  %v2476_v32 = vrot.slane %v5404_v4, %v5320_v1 }
 0xc04   :  { %3381 = vmatprep.subr.bf16.mxu0 %v4629_v33  ;;  %v3858_v33 = vld [vmem:[%s5536_s4 + $0xc] ss:$0 sm:$0xff] }
 0xc05   :  { %v2680_v4 = vadd.f32 %v5410_v36, %v2476_v32  ;;  %v3191_v36 = vld [vmem:[%s5536_s4 + $0xd] sm:$0xf] }
 0xc07   :  { %3382 = vmatpush1.bf16.msra.mxu0 %v4627_v35 }
 0xc08   :  { %3383 = vmatprep.subr.bf16.mxu0 %v4635_v21 }
 0xc0b   :  { %3384 = vmatpush1.bf16.msra.mxu0 %v4633_v55 }
 0xc0c   :  { %3385 = vmatprep.subr.bf16.mxu0 %v4641_v23 }
 0xc0f   :  { %3386 = vmatpush1.bf16.msra.mxu0 %v4639_v25 }
 0xc10   :  { %3387 = vmatprep.subr.bf16.mxu0 %v4647_v27 }
 0xc13   :  { %3388 = vmatpush1.bf16.msra.mxu0 %v4645_v29 }
 0xca9   :  { %v4092_v37 = vpop.f32.mrb[48].mxu0 }
 0xcaa   :  { %v4093_v42 = vpop.f32.mrb[49].mxu0 }
 0xcab   :  { %v4094_v56 = vadd.f32 %v4093_v42, %v4092_v37  ;;  %v4095_v43 = vpop.f32.mrb[50].mxu0  ;;  %v2686_v37 = vadd.f32 %v5414_v52, %v2476_v32 }
 0xcac   :  { %v4096_v45 = vpop.f32.mrb[51].mxu0 }
 0xcad   :  { %v4097_v46 = vadd.f32 %v4096_v45, %v4095_v43  ;;  %v2960_v2 = vadd.f32 %v4094_v56, %v3817_v61  ;;  %v2676_v43 = vadd.f32 %v5408_v31, %v2476_v32  ;;  %v3203_v31 = vsub.s32 2, %v4811_v17 }
 0xcaf   :  { %v2963_v8 = vadd.f32 %v4097_v46, %v3817_v61 }
 0xcb1   :  { %v4098_v47 = vpop.f32.mrb[52].mxu0 }
 0xcb2   :  { %v4099_v50 = vpop.f32.mrb[53].mxu0 }
 0xcb3   :  { %v4100_v51 = vadd.f32 %v4099_v50, %v4098_v47  ;;  %v4101_v53 = vpop.f32.mrb[54].mxu0  ;;  %v2690_v47 = vadd.f32 %v5418_v62, %v2476_v32  ;;  %v3207_v62 = vsub.s32 3, %v4811_v17 }
 0xcb4   :  { %v4102_v58 = vpop.f32.mrb[55].mxu0 }
 0xcb5   :  { %v4103_v60 = vadd.f32 %v4102_v58, %v4101_v53  ;;  %v2968_v63 = vadd.f32 %v4100_v51, %v3817_v61 }
 0xcb7   :  { %v2971_v6 = vadd.f32 %v4103_v60, %v3817_v61 }
 0xcc9   :  { %v4280_v0 = vpop.f32.mrb[56].mxu0 }
 0xcca   :  { %v3017_v3 = vadd.f32 %v4280_v0, %v2968_v63  ;;  %v3008_v5 = vpop.f32.mrb[57].mxu0 }
 0xccb   :  { %v3009_v20 = vadd.f32 %v3008_v5, %v2960_v2  ;;  %v4281_v7 = vpop.f32.mrb[58].mxu0 }
 0xccc   :  { %v3020_v9 = vadd.f32 %v4281_v7, %v2971_v6  ;;  %v3011_v10 = vpop.f32.mrb[59].mxu0  ;;  %v3025_v12 = vmax.f32 %v3017_v3, 0.0  ;;  %v3204_v7 = vrot.slane %v3191_v36, %v3203_v31 }
 0xccd   :  { %v3012_v11 = vadd.f32 %v3011_v10, %v2963_v8  ;;  %v3023_v57 = vmax.f32 %v3009_v20, 0.0  ;;  %v3196_v20 = vrot.slane %v3191_v36, %v5226_v38  ;;  %v3200_v8 = vrot.slane %v3191_v36, %v5320_v1 }
 0xcce   :  { %v3026_v13 = vmax.f32 %v3020_v9, 0.0  ;;  %v3208_v9 = vrot.slane %v3191_v36, %v3207_v62 }
 0xccf   :  { %v3024_v14 = vmax.f32 %v3012_v11, 0.0 }
 0xcd0   :  { %v3028_v15 = vpack.c.bf16 %v3026_v13, %v3025_v12 }
 0xcd1   :  { %v3027_v39 = vpack.c.bf16 %v3024_v14, %v3023_v57 }
 0xcd3   :  { %4298 = vmatprep.mubr.bf16.mxu1 %v3027_v39 }
 0xcd4   :  { %4299 = vmatmul.mubr.bf16.vlgmr.msra.gmra.mrb[40].mxu1 %v3028_v15 }
 0xcd5   :  { %3427 = vmatpush1.bf16.msra.mxu1 %v4606_v44  ;;  %3458 = vmatprep.mubr.bf16.mxu1 %v4706_v59 }
 0xcd6   :  { %3428 = vmatprep.subr.bf16.mxu1 %v4614_v34 }
 0xcd9   :  { %3429 = vmatpush1.bf16.msra.mxu1 %v4612_v16 }
 0xcda   :  { %3430 = vmatprep.subr.bf16.mxu1 %v4620_v54 }
 0xcdd   :  { %3431 = vmatpush1.bf16.msra.mxu1 %v4618_v41 }
 0xcde   :  { %3432 = vmatprep.subr.bf16.mxu1 %v4626_v18 }
 0xce1   :  { %3433 = vmatpush1.bf16.msra.mxu1 %v4624_v49 }
 0xce2   :  { %3434 = vmatprep.subr.bf16.mxu1 %v4632_v19 }
 0xce5   :  { %3435 = vmatpush1.bf16.msra.mxu1 %v4630_v48 }
 0xce6   :  { %3436 = vmatprep.subr.bf16.mxu1 %v4638_v22 }
 0xce9   :  { %3437 = vmatpush1.bf16.msra.mxu1 %v4636_v40 }
 0xcea   :  { %3438 = vmatprep.subr.bf16.mxu1 %v4644_v24 }
 0xced   :  { %3439 = vmatpush1.bf16.msra.mxu1 %v4642_v26 }
 0xcee   :  { %3440 = vmatprep.subr.bf16.mxu1 %v4650_v28 }
 0xcf1   :  { %3441 = vmatpush1.bf16.msra.mxu1 %v4648_v30 }
 0xda7   :  { %v4300_v35 = vpop.f32.mrb[40].mxu1 }
 0xda8   :  { %v3143_v42 = vadd.f32 %v4300_v35, %v3858_v33  ;;  %v3134_v56 = vpop.f32.mrb[41].mxu1 }
 0xda9   :  { %v3135_v45 = vadd.f32 %v3858_v33, %v3134_v56  ;;  %v4301_v46 = vpop.f32.mrb[42].mxu1 }
 0xdaa   :  { %v3151_v50 = vadd.f32 %v3143_v42, %v2686_v37  ;;  %v3146_v51 = vadd.f32 %v4301_v46, %v3858_v33  ;;  %v3137_v53 = vpop.f32.mrb[43].mxu1 }
 0xdab   :  { %v3149_v58 = vadd.f32 %v3135_v45, %v2676_v43  ;;  %v3138_v60 = vadd.f32 %v3858_v33, %v3137_v53 }
 0xdac   :  { %v3152_v61 = vadd.f32 %v3146_v51, %v2690_v47  ;;  %v3155_v0 = vmax.f32 %v3151_v50, 0.0 }
 0xdad   :  { %v3150_v63 = vadd.f32 %v3138_v60, %v2680_v4  ;;  %v3153_v52 = vmax.f32 %v3149_v58, 0.0 }
 0xdae   :  { %v3156_v2 = vmax.f32 %v3152_v61, 0.0 }
 0xdaf   :  { %v3154_v3 = vmax.f32 %v3150_v63, 0.0 }
 0xdb0   :  { %v3158_v5 = vpack.c.bf16 %v3156_v2, %v3155_v0 }
 0xdb1   :  { %v3157_v6 = vpack.c.bf16 %v3154_v3, %v3153_v52 }
 0xdb3   :  { %3406 = vmatmul.mubr.bf16.vlgmr.msra.gmra.mrb[60].mxu0 %v3157_v6  ;;  %3459 = vmatmul.mubr.bf16.vlgmr.msra.gmra.mrb[44].mxu1 %v3157_v6 }
 0xdb4   :  { %3415 = vmatprep.mubr.bf16.mxu0 %v4706_v59  ;;  %3468 = vmatprep.mubr.bf16.mxu1 %v4706_v59 }
 0xdbb   :  { %3416 = vmatmul.mubr.bf16.gmra.mrb[64].mxu0 %v3158_v5  ;;  %3469 = vmatmul.mubr.bf16.gmra.mrb[48].mxu1 %v3158_v5 }
 0xe86   :  { %v3407_v10 = vpop.f32.mrb[60].mxu0  ;;  %v3460_v11 = vpop.f32.mrb[44].mxu1 }
 0xe87   :  { %v3408_v12 = vadd.f32 %v3407_v10, %v3196_v20  ;;  %v3461_v59 = vadd.f32 %v3460_v11, %v3204_v7  ;;  %v3409_v13 = vpop.f32.mrb[61].mxu0  ;;  %v3462_v57 = vpop.f32.mrb[45].mxu1 }
 0xe88   :  { %v3410_v14 = vadd.f32 %v3409_v13, %v3200_v8  ;;  %v3463_v15 = vadd.f32 %v3462_v57, %v3208_v9  ;;  %v3411_v39 = vpop.f32.mrb[62].mxu0  ;;  %v3464_v44 = vpop.f32.mrb[46].mxu1 }
 0xe89   :  { %v3412_v34 = vadd.f32 %v3411_v39, %v3196_v20  ;;  %v3465_v16 = vadd.f32 %v3464_v44, %v3204_v7  ;;  %v3413_v54 = vpop.f32.mrb[63].mxu0  ;;  %v3466_v17 = vpop.f32.mrb[47].mxu1 }
 0xe8a   :  { %v3907_v41 = vpack.c.bf16 %v3410_v14, %v3408_v12  ;;  %v3908_v38 = vpack.c.bf16 %v3463_v15, %v3461_v59  ;;  %v3414_v18 = vadd.f32 %v3413_v54, %v3200_v8  ;;  %v3467_v49 = vadd.f32 %v3466_v17, %v3208_v9 }
 0xe8c   :  { %3527 = vst [vmem:[%s5537_s5] sm:$0xff] %v3907_v41  ;;  %3528 = vst [vmem:[%s5537_s5 + $0x8] sm:$0xff] %v3908_v38  ;;  %v3909_v1 = vpack.c.bf16 %v3414_v18, %v3412_v34  ;;  %v3910_v19 = vpack.c.bf16 %v3467_v49, %v3465_v16 }
 0xe8e   :  { %3529 = vst [vmem:[%s5537_s5 + $0x10] sm:$0xff] %v3909_v1  ;;  %3530 = vst [vmem:[%s5537_s5 + $0x18] sm:$0xff] %v3910_v19  ;;  %v3417_v48 = vpop.f32.mrb[64].mxu0  ;;  %v3470_v21 = vpop.f32.mrb[48].mxu1 }
 0xe8f   :  { %v3418_v22 = vadd.f32 %v3417_v48, %v3196_v20  ;;  %v3471_v55 = vadd.f32 %v3470_v21, %v3204_v7  ;;  %v3419_v40 = vpop.f32.mrb[65].mxu0  ;;  %v3472_v23 = vpop.f32.mrb[49].mxu1 }
 0xe90   :  { %v3420_v24 = vadd.f32 %v3419_v40, %v3200_v8  ;;  %v3473_v25 = vadd.f32 %v3472_v23, %v3208_v9  ;;  %v3421_v26 = vpop.f32.mrb[66].mxu0  ;;  %v3474_v27 = vpop.f32.mrb[50].mxu1 }
 0xe91   :  { %v3422_v28 = vadd.f32 %v3421_v26, %v3196_v20  ;;  %v3475_v29 = vadd.f32 %v3474_v27, %v3204_v7  ;;  %v3423_v30 = vpop.f32.mrb[67].mxu0  ;;  %v3476_v32 = vpop.f32.mrb[51].mxu1 }
 0xe92   :  { %v3911_v33 = vpack.c.bf16 %v3420_v24, %v3418_v22  ;;  %v3912_v35 = vpack.c.bf16 %v3473_v25, %v3471_v55  ;;  %v3424_v37 = vadd.f32 %v3423_v30, %v3200_v8  ;;  %v3477_v42 = vadd.f32 %v3476_v32, %v3208_v9 }
 0xe94   :  { %3531 = vst [vmem:[%s5537_s5 + $0x20] sm:$0xff] %v3911_v33  ;;  %3532 = vst [vmem:[%s5537_s5 + $0x28] sm:$0xff] %v3912_v35  ;;  %v3913_v56 = vpack.c.bf16 %v3424_v37, %v3422_v28  ;;  %v3914_v43 = vpack.c.bf16 %v3477_v42, %v3475_v29 }
 0xe96   :  { %3533 = vst [vmem:[%s5537_s5 + $0x30] sm:$0xff] %v3913_v56  ;;  %3534 = vst [vmem:[%s5537_s5 + $0x38] sm:$0xff] %v3914_v43 }
 0xe97   :  { %3539 = vsyncpa [#allocation3], 1 }
 0xe98   :  { %3540 = vsyncpa [#allocation5], 1 }

</bundles_post_ra>
